<compile_context>
chip_gen: v5e
topology: v5e:2x2
jax: 0.10.0
libtpu: 0.0.40
codegen_flags: <defaults>
</compile_context>

<pallas_src>
import jax
import jax.numpy as jnp
from jax.experimental import pallas as pl
from jax.experimental.pallas import tpu as pltpu

LN_EPS = 1e-5      # nn.LayerNorm default
NORM_EPS = 1e-12   # F.normalize default


def mixvpr_kernel(x_ref, gamma_ref, beta_ref,
                  w1t_ref, b1_ref, w2t_ref, b2_ref,
                  wrt_ref, wc_ref, bias_ref,
                  out_ref):
    Bt, C, HW = x_ref.shape
    out_c = wc_ref.shape[0]
    R = wrt_ref.shape[1]
    mdt = w1t_ref.dtype                      # MXU operand dtype (f32 or bf16)

    # Fold batch tile into the matmul M dimension (leading-dim merge is free).
    x = x_ref[...].reshape(Bt * C, HW)       # (Bt*C, HW), f32

    # ---- FeatureMixerLayer: LayerNorm over HW + MLP + residual (f32 VPU) ----
    mean = jnp.mean(x, axis=-1, keepdims=True)
    var = jnp.mean((x - mean) ** 2, axis=-1, keepdims=True)
    xn = (x - mean) * jax.lax.rsqrt(var + LN_EPS)
    xn = xn * gamma_ref[...] + beta_ref[...]

    # Pre-transposed weights: feed the MXU directly, accumulate in f32.
    h = jnp.dot(xn.astype(mdt), w1t_ref[...],
                preferred_element_type=jnp.float32) + b1_ref[...]
    h = jnp.maximum(h, 0.0)
    m = jnp.dot(h.astype(mdt), w2t_ref[...],
                preferred_element_type=jnp.float32) + b2_ref[...]
    x = x + m                                # residual, f32, (Bt*C, HW)

    # ---- Reassociated projections: row_proj first, then channel_proj --------
    # t = x @ Wr^T : (Bt*C, R)   (R = out_rows << HW)
    t = jnp.dot(x.astype(mdt), wrt_ref[...],
                preferred_element_type=jnp.float32)
    t3 = t.reshape(Bt, C, R).astype(mdt)     # leading-dim split (layout free)

    # z[b] = Wc @ t[b] : canonical batched matmul (Bt, out_c, C) x (Bt, C, R)
    wc_b = jnp.broadcast_to(wc_ref[...][None], (Bt, out_c, C))
    z = jax.lax.dot_general(wc_b, t3,
                            (((2,), (1,)), ((0,), (0,))),
                            preferred_element_type=jnp.float32)   # (Bt, out_c, R)

    # Flatten to the lane-dense descriptor (PyTorch flatten(1) order) and add
    # the folded bias  bc * sum(Wr, -1) + br.
    flat = z.reshape(Bt, out_c * R) + bias_ref[...]               # (Bt, out_c*R)

    # ---- L2 normalize per batch row: rsqrt (EUP) + multiply (VPU) ------------
    ssq = jnp.sum(flat * flat, axis=-1, keepdims=True)
    inv = jax.lax.rsqrt(jnp.maximum(ssq, NORM_EPS * NORM_EPS))
    out_ref[...] = (flat * inv).astype(out_ref.dtype)


def mixvpr_agg(x, params, *, out_channels, out_rows, block_b=None,
               mxu_dtype=jnp.float32):
    """x: (B, C, H, W) float32 -> (B, out_channels*out_rows) float32."""
    B, C, H, W = x.shape
    HW = H * W
    hidden = params["w1"].shape[0]
    out_flat = out_channels * out_rows

    if block_b is None:
        block_b = min(B, 8)
    assert B % block_b == 0, "batch must be divisible by block_b"
    grid_b = B // block_b

    x_flat = x.reshape(B, C, HW)

    # --- wrapper-side weight prep (one-time): pre-transpose, cast, fold bias --
    wdt = mxu_dtype
    w1t = params["w1"].T.astype(wdt)                  # (HW, hidden)
    w2t = params["w2"].T.astype(wdt)                  # (hidden, HW)
    wrt = params["wr"].T.astype(wdt)                  # (HW, out_rows)
    wc = params["wc"].astype(wdt)                     # (out_c, C)
    wr_sum = jnp.sum(params["wr"], axis=-1)           # (out_rows,)
    # (Wc x + bc) Wr^T + br  ==  Wc (x Wr^T) + (bc * sum(Wr,-1) + br)
    bias_flat = (params["bc"] * wr_sum[None, :]
                 + params["br"]).reshape(1, out_flat).astype(jnp.float32)

    const = lambda shape: pl.BlockSpec(shape, lambda b: tuple(0 for _ in shape))

    out = pl.pallas_call(
        mixvpr_kernel,
        out_shape=jax.ShapeDtypeStruct((B, out_flat), jnp.float32),
        grid_spec=pltpu.PrefetchScalarGridSpec(
            num_scalar_prefetch=0,
            grid=(grid_b,),
            in_specs=[
                pl.BlockSpec((block_b, C, HW), lambda b: (b, 0, 0)),  # x
                const((1, HW)),                                       # gamma
                const((1, HW)),                                       # beta
                const((HW, hidden)),                                  # W1^T
                const((1, hidden)),                                   # b1
                const((hidden, HW)),                                  # W2^T
                const((1, HW)),                                       # b2
                const((HW, out_rows)),                                # Wr^T
                const((out_channels, C)),                             # Wc
                const((1, out_flat)),                                 # folded bias
            ],
            out_specs=pl.BlockSpec((block_b, out_flat), lambda b: (b, 0)),
        ),
        compiler_params=pltpu.CompilerParams(
            dimension_semantics=("parallel",),     # grid_b >= 2 -> v7x megacore
            vmem_limit_bytes=32 * 1024 * 1024,
        ),
    )(x_flat, params["gamma"], params["beta"],
      w1t, params["b1"], w2t, params["b2"],
      wrt, wc, bias_flat)
    return out


def reference_jax(x, params):
    """Pure-JAX reference mirroring the PyTorch forward (for verification)."""
    B, C, H, W = x.shape
    HW = H * W
    v = x.reshape(B, C, HW)
    # FeatureMixerLayer
    mean = jnp.mean(v, axis=-1, keepdims=True)
    var = jnp.mean((v - mean) ** 2, axis=-1, keepdims=True)
    vn = (v - mean) / jnp.sqrt(var + LN_EPS) * params["gamma"][0] + params["beta"][0]
    h = jnp.maximum(vn @ params["w1"].T + params["b1"][0], 0.0)
    v = v + (h @ params["w2"].T + params["b2"][0])
    # channel_proj / row_proj (original, un-reassociated order)
    y = jnp.transpose(v, (0, 2, 1)) @ params["wc"].T + params["bc"][:, 0]
    z = jnp.transpose(y, (0, 2, 1)) @ params["wr"].T + params["br"][0]
    flat = z.reshape(B, -1)
    n = jnp.maximum(jnp.linalg.norm(flat, axis=-1, keepdims=True), NORM_EPS)
    return flat / n


def make_params(key, *, in_channels, hw, out_channels, out_rows, mlp_ratio=1):
    hidden = int(hw * mlp_ratio)
    ks = jax.random.split(key, 6)
    return {
        # FeatureMixerLayer: LayerNorm(hw) + Linear(hw->hidden) + Linear(hidden->hw)
        "gamma": jnp.ones((1, hw), jnp.float32),
        "beta": jnp.zeros((1, hw), jnp.float32),
        "w1": 0.02 * jax.random.normal(ks[0], (hidden, hw), jnp.float32),
        "b1": jnp.zeros((1, hidden), jnp.float32),
        "w2": 0.02 * jax.random.normal(ks[1], (hw, hidden), jnp.float32),
        "b2": jnp.zeros((1, hw), jnp.float32),
        # channel_proj / row_proj (deterministic synthetic init)
        "wc": 0.05 * jax.random.normal(ks[2], (out_channels, in_channels), jnp.float32),
        "bc": 0.01 * jax.random.normal(ks[3], (out_channels, 1), jnp.float32),
        "wr": 0.05 * jax.random.normal(ks[4], (out_rows, hw), jnp.float32),
        "br": 0.01 * jax.random.normal(ks[5], (1, out_rows), jnp.float32),
    }


if __name__ == "__main__":
    # Small, module-consistent shapes: in_channels=32, in_h=in_w=8 (hw=64),
    # out_channels=16, mix_depth=1, mlp_ratio=1, out_rows=4.
    # B=16 with block_b=8 -> grid of 2 batch tiles (8-row sublane-aligned
    # output blocks, even grid for v7x megacore).
    B, C, H, W = 16, 32, 8, 8
    OUT_C, OUT_R = 16, 4

    key = jax.random.PRNGKey(0)
    kx, kp = jax.random.split(key)
    x = jax.random.normal(kx, (B, C, H, W), jnp.float32)
    params = make_params(kp, in_channels=C, hw=H * W,
                         out_channels=OUT_C, out_rows=OUT_R)

    ref = reference_jax(x, params)

    # f32 MXU-operand path: tight check against the un-reassociated reference.
    out = mixvpr_agg(x, params, out_channels=OUT_C, out_rows=OUT_R, block_b=8)
    out = jax.block_until_ready(out)
    assert out.shape == (B, OUT_C * OUT_R)
    assert jnp.allclose(out, ref, atol=2e-5, rtol=1e-5)

    # bf16 MXU-operand path (f32 accumulation, f32 LayerNorm/residual/norm):
    # looser tolerance per bf16 mantissa.
    out_bf16 = mixvpr_agg(x, params, out_channels=OUT_C, out_rows=OUT_R,
                          block_b=8, mxu_dtype=jnp.bfloat16)
    out_bf16 = jax.block_until_ready(out_bf16)
    assert jnp.allclose(out_bf16, ref, atol=3e-2, rtol=3e-2)

    print("KERNEL_OK")
</pallas_src>

<mosaic_0001>
module attributes {stable_mosaic.version = 11 : i64} {
  func.func @mixvpr_kernel(%arg0: i32, %arg1: memref<8x32x64xf32, #tpu.memory_space<vmem>>, %arg2: memref<1x64xf32, #tpu.memory_space<vmem>>, %arg3: memref<1x64xf32, #tpu.memory_space<vmem>>, %arg4: memref<64x64xf32, #tpu.memory_space<vmem>>, %arg5: memref<1x64xf32, #tpu.memory_space<vmem>>, %arg6: memref<64x64xf32, #tpu.memory_space<vmem>>, %arg7: memref<1x64xf32, #tpu.memory_space<vmem>>, %arg8: memref<64x4xf32, #tpu.memory_space<vmem>>, %arg9: memref<16x32xf32, #tpu.memory_space<vmem>>, %arg10: memref<1x64xf32, #tpu.memory_space<vmem>>, %arg11: memref<8x64xf32, #tpu.memory_space<vmem>>) attributes {dimension_semantics = [#tpu.dimension_semantics<parallel>], iteration_bounds = array<i64: 2>, scalar_prefetch = 0 : i64, scratch_operands = 0 : i64, tpu.core_type = #tpu.core_type<tc>, window_params = [{transform_indices = @transform_0, window_bounds = array<i64: 8, 32, 64>}, {pipeline_mode = #tpu.pipeline_mode<synchronous>, transform_indices = @transform_1, window_bounds = array<i64: 1, 64>}, {pipeline_mode = #tpu.pipeline_mode<synchronous>, transform_indices = @transform_2, window_bounds = array<i64: 1, 64>}, {pipeline_mode = #tpu.pipeline_mode<synchronous>, transform_indices = @transform_3, window_bounds = array<i64: 64, 64>}, {pipeline_mode = #tpu.pipeline_mode<synchronous>, transform_indices = @transform_4, window_bounds = array<i64: 1, 64>}, {pipeline_mode = #tpu.pipeline_mode<synchronous>, transform_indices = @transform_5, window_bounds = array<i64: 64, 64>}, {pipeline_mode = #tpu.pipeline_mode<synchronous>, transform_indices = @transform_6, window_bounds = array<i64: 1, 64>}, {pipeline_mode = #tpu.pipeline_mode<synchronous>, transform_indices = @transform_7, window_bounds = array<i64: 64, 4>}, {pipeline_mode = #tpu.pipeline_mode<synchronous>, transform_indices = @transform_8, window_bounds = array<i64: 16, 32>}, {pipeline_mode = #tpu.pipeline_mode<synchronous>, transform_indices = @transform_9, window_bounds = array<i64: 1, 64>}, {transform_indices = @transform_10, window_bounds = array<i64: 8, 64>}]} {
    %c0 = arith.constant 0 : index
    %c0_0 = arith.constant 0 : index
    %c0_1 = arith.constant 0 : index
    %0 = vector.load %arg1[%c0, %c0_0, %c0_1] : memref<8x32x64xf32, #tpu.memory_space<vmem>>, vector<8x32x64xf32>
    %1 = vector.shape_cast %0 : vector<8x32x64xf32> to vector<256x64xf32>
    %cst = arith.constant dense<0.000000e+00> : vector<256xf32>
    %2 = vector.multi_reduction <add>, %1, %cst [1] : vector<256x64xf32> to vector<256xf32>
    %3 = vector.shape_cast %2 : vector<256xf32> to vector<256x1xf32>
    %cst_2 = arith.constant 6.400000e+01 : f32
    %4 = vector.broadcast %cst_2 : f32 to vector<256x1xf32>
    %5 = arith.divf %3, %4 : vector<256x1xf32>
    %6 = vector.broadcast %5 : vector<256x1xf32> to vector<256x64xf32>
    %7 = arith.subf %1, %6 : vector<256x64xf32>
    %8 = arith.mulf %7, %7 : vector<256x64xf32>
    %cst_3 = arith.constant dense<0.000000e+00> : vector<256xf32>
    %9 = vector.multi_reduction <add>, %8, %cst_3 [1] : vector<256x64xf32> to vector<256xf32>
    %10 = vector.shape_cast %9 : vector<256xf32> to vector<256x1xf32>
    %cst_4 = arith.constant 6.400000e+01 : f32
    %11 = vector.broadcast %cst_4 : f32 to vector<256x1xf32>
    %12 = arith.divf %10, %11 : vector<256x1xf32>
    %13 = vector.broadcast %5 : vector<256x1xf32> to vector<256x64xf32>
    %14 = arith.subf %1, %13 : vector<256x64xf32>
    %cst_5 = arith.constant 9.99999974E-6 : f32
    %15 = vector.broadcast %cst_5 : f32 to vector<256x1xf32>
    %16 = arith.addf %12, %15 : vector<256x1xf32>
    %17 = math.rsqrt %16 : vector<256x1xf32>
    %18 = vector.broadcast %17 : vector<256x1xf32> to vector<256x64xf32>
    %19 = arith.mulf %14, %18 : vector<256x64xf32>
    %c0_6 = arith.constant 0 : index
    %c0_7 = arith.constant 0 : index
    %20 = vector.load %arg2[%c0_6, %c0_7] : memref<1x64xf32, #tpu.memory_space<vmem>>, vector<1x64xf32>
    %21 = vector.broadcast %20 : vector<1x64xf32> to vector<256x64xf32>
    %22 = arith.mulf %19, %21 : vector<256x64xf32>
    %c0_8 = arith.constant 0 : index
    %c0_9 = arith.constant 0 : index
    %23 = vector.load %arg3[%c0_8, %c0_9] : memref<1x64xf32, #tpu.memory_space<vmem>>, vector<1x64xf32>
    %24 = vector.broadcast %23 : vector<1x64xf32> to vector<256x64xf32>
    %25 = arith.addf %22, %24 : vector<256x64xf32>
    %c0_10 = arith.constant 0 : index
    %c0_11 = arith.constant 0 : index
    %26 = vector.load %arg4[%c0_10, %c0_11] : memref<64x64xf32, #tpu.memory_space<vmem>>, vector<64x64xf32>
    %cst_12 = arith.constant dense<0.000000e+00> : vector<256x64xf32>
    %27 = tpu.matmul %25, %26, %cst_12 {dimension_numbers = #tpu.dot_dimension_numbers<[1], [0], [0], [1], [0, 0, 1, 1], [], []>} : vector<256x64xf32>, vector<64x64xf32>, vector<256x64xf32> -> vector<256x64xf32>
    %c0_13 = arith.constant 0 : index
    %c0_14 = arith.constant 0 : index
    %28 = vector.load %arg5[%c0_13, %c0_14] : memref<1x64xf32, #tpu.memory_space<vmem>>, vector<1x64xf32>
    %29 = vector.broadcast %28 : vector<1x64xf32> to vector<256x64xf32>
    %30 = arith.addf %27, %29 : vector<256x64xf32>
    %cst_15 = arith.constant 0.000000e+00 : f32
    %31 = vector.broadcast %cst_15 : f32 to vector<256x64xf32>
    %32 = arith.maximumf %30, %31 : vector<256x64xf32>
    %c0_16 = arith.constant 0 : index
    %c0_17 = arith.constant 0 : index
    %33 = vector.load %arg6[%c0_16, %c0_17] : memref<64x64xf32, #tpu.memory_space<vmem>>, vector<64x64xf32>
    %cst_18 = arith.constant dense<0.000000e+00> : vector<256x64xf32>
    %34 = tpu.matmul %32, %33, %cst_18 {dimension_numbers = #tpu.dot_dimension_numbers<[1], [0], [0], [1], [0, 0, 1, 1], [], []>} : vector<256x64xf32>, vector<64x64xf32>, vector<256x64xf32> -> vector<256x64xf32>
    %c0_19 = arith.constant 0 : index
    %c0_20 = arith.constant 0 : index
    %35 = vector.load %arg7[%c0_19, %c0_20] : memref<1x64xf32, #tpu.memory_space<vmem>>, vector<1x64xf32>
    %36 = vector.broadcast %35 : vector<1x64xf32> to vector<256x64xf32>
    %37 = arith.addf %34, %36 : vector<256x64xf32>
    %38 = arith.addf %1, %37 : vector<256x64xf32>
    %c0_21 = arith.constant 0 : index
    %c0_22 = arith.constant 0 : index
    %39 = vector.load %arg8[%c0_21, %c0_22] : memref<64x4xf32, #tpu.memory_space<vmem>>, vector<64x4xf32>
    %cst_23 = arith.constant dense<0.000000e+00> : vector<256x4xf32>
    %40 = tpu.matmul %38, %39, %cst_23 {dimension_numbers = #tpu.dot_dimension_numbers<[1], [0], [0], [1], [0, 0, 1, 1], [], []>} : vector<256x64xf32>, vector<64x4xf32>, vector<256x4xf32> -> vector<256x4xf32>
    %41 = vector.shape_cast %40 : vector<256x4xf32> to vector<8x32x4xf32>
    %c0_24 = arith.constant 0 : index
    %c0_25 = arith.constant 0 : index
    %42 = vector.load %arg9[%c0_24, %c0_25] : memref<16x32xf32, #tpu.memory_space<vmem>>, vector<16x32xf32>
    %43 = vector.shape_cast %42 : vector<16x32xf32> to vector<1x16x32xf32>
    %44 = vector.shape_cast %43 : vector<1x16x32xf32> to vector<1x16x32xf32>
    %45 = vector.broadcast %44 : vector<1x16x32xf32> to vector<8x16x32xf32>
    %cst_26 = arith.constant dense<0.000000e+00> : vector<8x16x4xf32>
    %46 = tpu.matmul %45, %41, %cst_26 {dimension_numbers = #tpu.dot_dimension_numbers<[2], [1], [1], [2], [0, 0, 0, 1, 1, 2], [0], [0]>} : vector<8x16x32xf32>, vector<8x32x4xf32>, vector<8x16x4xf32> -> vector<8x16x4xf32>
    %47 = vector.shape_cast %46 : vector<8x16x4xf32> to vector<8x64xf32>
    %c0_27 = arith.constant 0 : index
    %c0_28 = arith.constant 0 : index
    %48 = vector.load %arg10[%c0_27, %c0_28] : memref<1x64xf32, #tpu.memory_space<vmem>>, vector<1x64xf32>
    %49 = vector.broadcast %48 : vector<1x64xf32> to vector<8x64xf32>
    %50 = arith.addf %47, %49 : vector<8x64xf32>
    %51 = arith.mulf %50, %50 : vector<8x64xf32>
    %cst_29 = arith.constant dense<0.000000e+00> : vector<8xf32>
    %52 = vector.multi_reduction <add>, %51, %cst_29 [1] : vector<8x64xf32> to vector<8xf32>
    %53 = vector.shape_cast %52 : vector<8xf32> to vector<8x1xf32>
    %cst_30 = arith.constant 1.000000e-24 : f32
    %54 = vector.broadcast %cst_30 : f32 to vector<8x1xf32>
    %55 = arith.maximumf %53, %54 : vector<8x1xf32>
    %56 = math.rsqrt %55 : vector<8x1xf32>
    %57 = vector.broadcast %56 : vector<8x1xf32> to vector<8x64xf32>
    %58 = arith.mulf %50, %57 : vector<8x64xf32>
    %c0_31 = arith.constant 0 : index
    %c0_32 = arith.constant 0 : index
    %59 = vector.load %arg11[%c0_31, %c0_32] : memref<8x64xf32, #tpu.memory_space<vmem>>, vector<8x64xf32>
    tpu.vector_store %arg11[%c0_31, %c0_32], %58 {strides = array<i32>} : memref<8x64xf32, #tpu.memory_space<vmem>>, vector<8x64xf32>,
    return
  }
  func.func @transform_0(%arg0: i32) -> (i32, i32, i32) {
    %c0_i32 = arith.constant 0 : i32
    %c0_i32_0 = arith.constant 0 : i32
    %c0_i32_1 = arith.constant 0 : i32
    return %arg0, %c0_i32, %c0_i32_0 : i32, i32, i32
  }
  func.func @transform_1(%arg0: i32) -> (i32, i32) {
    %c0_i32 = arith.constant 0 : i32
    %c0_i32_0 = arith.constant 0 : i32
    %c0_i32_1 = arith.constant 0 : i32
    return %c0_i32, %c0_i32_0 : i32, i32
  }
  func.func @transform_2(%arg0: i32) -> (i32, i32) {
    %c0_i32 = arith.constant 0 : i32
    %c0_i32_0 = arith.constant 0 : i32
    %c0_i32_1 = arith.constant 0 : i32
    return %c0_i32, %c0_i32_0 : i32, i32
  }
  func.func @transform_3(%arg0: i32) -> (i32, i32) {
    %c0_i32 = arith.constant 0 : i32
    %c0_i32_0 = arith.constant 0 : i32
    %c0_i32_1 = arith.constant 0 : i32
    return %c0_i32, %c0_i32_0 : i32, i32
  }
  func.func @transform_4(%arg0: i32) -> (i32, i32) {
    %c0_i32 = arith.constant 0 : i32
    %c0_i32_0 = arith.constant 0 : i32
    %c0_i32_1 = arith.constant 0 : i32
    return %c0_i32, %c0_i32_0 : i32, i32
  }
  func.func @transform_5(%arg0: i32) -> (i32, i32) {
    %c0_i32 = arith.constant 0 : i32
    %c0_i32_0 = arith.constant 0 : i32
    %c0_i32_1 = arith.constant 0 : i32
    return %c0_i32, %c0_i32_0 : i32, i32
  }
  func.func @transform_6(%arg0: i32) -> (i32, i32) {
    %c0_i32 = arith.constant 0 : i32
    %c0_i32_0 = arith.constant 0 : i32
    %c0_i32_1 = arith.constant 0 : i32
    return %c0_i32, %c0_i32_0 : i32, i32
  }
  func.func @transform_7(%arg0: i32) -> (i32, i32) {
    %c0_i32 = arith.constant 0 : i32
    %c0_i32_0 = arith.constant 0 : i32
    %c0_i32_1 = arith.constant 0 : i32
    return %c0_i32, %c0_i32_0 : i32, i32
  }
  func.func @transform_8(%arg0: i32) -> (i32, i32) {
    %c0_i32 = arith.constant 0 : i32
    %c0_i32_0 = arith.constant 0 : i32
    %c0_i32_1 = arith.constant 0 : i32
    return %c0_i32, %c0_i32_0 : i32, i32
  }
  func.func @transform_9(%arg0: i32) -> (i32, i32) {
    %c0_i32 = arith.constant 0 : i32
    %c0_i32_0 = arith.constant 0 : i32
    %c0_i32_1 = arith.constant 0 : i32
    return %c0_i32, %c0_i32_0 : i32, i32
  }
  func.func @transform_10(%arg0: i32) -> (i32, i32) {
    %c0_i32 = arith.constant 0 : i32
    %c0_i32_0 = arith.constant 0 : i32
    return %arg0, %c0_i32 : i32, i32
  }
}

</mosaic_0001>

<bundles_post_ra>
// kernel: tpu_custom_call.1
= control target key start
LH: loop header
LB: loop body
LE: loop exit
PB: predicated region body
PF: predicated region fallthrough
CT: control target
= control target key end

     0   :  { %s4687_s0 = inlined_call_operand.hbm [shape: f32[16,32,64], index: 0, kind: input, shape index: {}]   ;;  %s4688_s1 = inlined_call_operand.vmem [shape: f32[1,64], index: 1, kind: input, shape index: {}]   ;;  %s4689_s2 = inlined_call_operand.vmem [shape: f32[1,64], index: 2, kind: input, shape index: {}]   ;;  %s4690_s3 = inlined_call_operand.vmem [shape: f32[64,64], index: 3, kind: input, shape index: {}]   ;;  %s4691_s4 = inlined_call_operand.vmem [shape: f32[1,64], index: 4, kind: input, shape index: {}]   ;;  %s4692_s5 = inlined_call_operand.hbm [shape: f32[64,64], index: 5, kind: input, shape index: {}]   ;;  %s4693_s6 = inlined_call_operand.vmem [shape: f32[1,64], index: 6, kind: input, shape index: {}]   ;;  %s4694_s7 = inlined_call_operand.vmem [shape: f32[64,4], index: 7, kind: input, shape index: {}]   ;;  %s4695_s8 = inlined_call_operand.hbm [shape: f32[16,32], index: 8, kind: input, shape index: {}]   ;;  %s4696_s9 = inlined_call_operand.vmem [shape: f32[1,64], index: 9, kind: input, shape index: {}]   ;;  %s4697_s10 = inlined_call_operand.hbm [shape: f32[16,64], index: 10, kind: output, shape index: {}]  }
   0x1   :  { %4701 = sst [smem:[#allocation14_spill]] %s4692_s5 }
   0x2   :  { %4702 = sst [smem:[#allocation15_spill]] %s4695_s8 }
   0x3   :  { %15 = vsyncpa [#allocation3], 0 }
   0x4   :  { %17 = vsyncpa [#allocation3 + $0x1], 0 }
   0x5   :  { %18 = vsyncpa [#allocation6], 0 }
   0x6   :  { %19 = vsyncpa [#allocation4], 0 }
   0x7   :  { %21 = vsyncpa [#allocation4 + $0x1], 0  ;;  %s3179_s13 = smov 0   ;;  %s3181_s14 = smov 0  }
   0x8   :  { %s3183_s15 = smov 0   ;;  %s3185_s16 = smov 0  }
   0x9 LB: > { %4703 = sst [smem:[#allocation12_spill]] %s3096_s15  ;;  %s3200_s17 = sadd.s32 4294967295, %s3100_s16   ;;  %s3100_s16 = sphi %s3185_s16, %s4745_s16   ;;  %s3096_s15 = sphi %s3183_s15, %s4742_s15   ;;  %s3092_s14 = sphi %s3181_s14, %s4744_s14   ;;  %s3088_s13 = sphi %s3179_s13, %s4743_s13  }
   0xa   : > { %s2588_s18 = sadd.s32 4294967294, %s3100_s16   ;;  %p47_p0 = scmp.ne.s32.totalorder %s3092_s14, %s3088_s13 }
   0xb   : > { %p48_p1 = scmp.eq.s32.totalorder %s3200_s17, 0  ;;  %p260_p2 = scmp.eq.s32.totalorder %s3200_s17, 1 }
   0xc   : > { %p266_p3 = scmp.eq.s32.totalorder %s2588_s18, 1  ;;  %p2589_p5 = scmp.ge.s32.totalorder %s3100_s16, 1 }
   0xd   : > { %p3209_p4 = por %p48_p1, %p47_p0  ;;  %p273_p7 = scmp.lt.s32.totalorder %s3100_s16, 3 }
   0xe   : > { %p3214_p6 = por %p266_p3, %p47_p0  ;;  %s4706_s5 = sld [smem:[#allocation14_spill]] }
   0xf   : > { %p3222_p8 = pnand %p2589_p5, %p273_p7  ;;  %s3102_s25 = smov [#allocation5]  }
  0x10   : > { %s298_s26 = sshll.u32 %s3102_s25, 4  ;;  %s4708_s8 = sld [smem:[#allocation15_spill]]  ;;  %s299_s26 = int_to_ptr.vmem [resolvable:$true] %s298_s26 }
  0x11   : > { %p2756_p9 = pneg %p3222_p8  ;;  %s4698_s30 = smov 128  }
  0x12   : > { %s4699_s11 = smov 8   ;;  %s3105_s12 = smov [#allocation7]  }
  0x13   : > { %p2757_p10 = pnand %p2756_p9, %p48_p1  ;;  %s318_s18 = sshll.u32 %s3105_s12, 4  ;;  %s319_s18 = int_to_ptr.vmem [resolvable:$true] %s318_s18 }
  0x14   : > { %s296_s23 = sshll.u32 %s4706_s5, 4  ;;  %s3241_s21 = sadd.s32 1, %s3100_s16   ;;  %s297_s23 = int_to_ptr.hbm [resolvable:$true] %s296_s23 }
  0x15   : > { %2759 = dma.hbm_to_vmem [thread:$0]  (!%p2757_p10), %s297_s23, 1024, %s299_s26, [#allocation6], %s4698_s30, %s4698_s30, %s4699_s11  }
  0x16   : > { %s316_s29 = sshll.u32 %s4708_s8, 4  ;;  %s34_s22 = sadd.s32 1, %s3096_s15  ;;  %s317_s29 = int_to_ptr.hbm [resolvable:$true] %s316_s29 }
  0x17   : > { %2762 = dma.hbm_to_vmem [thread:$0]  (!%p2757_p10), %s317_s29, 256, %s319_s18, [#allocation6], %s4698_s30, %s4698_s30, %s4699_s11  }
  0x18   : > { %s31_s25 = ssub.s32 %s3100_s16, %s3241_s21  ;;  %p41_p12 = scmp.ne.s32.totalorder %s3096_s15, %s3092_s14 }
  0x19   : > { %p32_p13 = scmp.eq.s32.totalorder %s31_s25, 0  ;;  %p42_p0 = scmp.eq.s32.totalorder %s3100_s16, 0 }
  0x1a   : > { %p3251_p3 = por %p260_p2, %p41_p12  ;;  %p2773_p5 = scmp.lt.s32.totalorder %s3100_s16, 2 }
  0x1b   : > { %s3257_s23 = scalar_select %p32_p13, %s3096_s15, %s34_s22  }
  0x1c   : > { %p43_p7 = por %p42_p0, %p41_p12  ;;  %s335_s26 = sand.u32 1, %s3096_s15  }
  0x1d   : > { %4710 = sst [smem:[#allocation13_spill]] %s3257_s23  ;;  %s2593_s28 = sshll.u32 %s335_s26, 8 }
  0x1e   : > { %s2719_s29 = sshll.u32 %s3100_s16, 8  ;;  %s339_s11 = scalar_lea.vmem [#allocation2], %s2593_s28 }
  0x1f   : > { %s345_s30 = scalar_lea.hbm %s4687_s0, %s2719_s29  ;;  %s348_s5 = sshll.u32 %s339_s11, 4  ;;  %s349_s5 = int_to_ptr.vmem [resolvable:$true] %s348_s5 }
  0x20   : > { %s346_s25 = sshll.u32 %s345_s30, 4  ;;  %p3264_p2 = pnand %p2773_p5, %p43_p7  ;;  %s347_s25 = int_to_ptr.hbm [resolvable:$true] %s346_s25 }
  0x21   : > { %s336_s22 = scalar_lea.sflag [#allocation3], %s335_s26  ;;  %s3000_s23 = sshra.s32 %s347_s25, 4  ;;  %s3001_s23 = int_to_ptr.hbm [resolvable:$true] %s3000_s23 }
  0x22   : > { %s3002_s15 = scalar_lea.hbm %s3001_s23, 256  ;;  %p3004_p10 = pneg %p3264_p2 }
  0x23   : > { %p3003_p9 = scmp.ne.s32.totalorder %s3001_s23, %s3002_s15  ;;  %s3007_s30 = scalar_lea.hbm %s4687_s0, 512 }
  0x24   : > { %p3008_p0 = scmp.lt.s32.totalorder %s3001_s23, %s4687_s0  ;;  %p3009_p5 = scmp.lt.s32.totalorder %s3007_s30, %s3002_s15 }
  0x25   : > { %p3005_p12 = pnand %p3004_p10, %p3003_p9 }
  0x26   : > { %p3010_p7 = por %p3009_p5, %p3008_p0 }
  0x27   : > { %p3006_p13 = pneg %p3005_p12 }
  0x29   : > { %p3011_p11 = pnand %p3010_p7, %p3006_p13 }
  0x2b   : > { %3014 = shalt.err (!%p3011_p11)
}
  0x2c   : > { %s4712_s26 = smov 8   ;;  %s4713_s18 = smov 128  }
  0x2d   : > { %2766 = dma.hbm_to_vmem [thread:$0]  (!%p3264_p2), %s347_s25, 4096, %s349_s5, %s336_s22, %s4713_s18, %s4713_s18, %s4712_s26  }
  0x2e   : > { %360 = sbr.rel (%p3222_p8) target bundleno = 1616 (0x650), region = 60  ;;  %s3284_s29 = sand.u32 (!%p3222_p8), 1, %s3092_s14  }
  0x2f   : > { %s2598_s23 = sshll.u32 (!%p3222_p8), %s3284_s29, 8  ;;  %s363_s15 = scalar_lea.sflag (!%p3222_p8), [#allocation3], %s3284_s29 }
  0x30   : > { %s3288_s28 = scalar_lea.vmem (!%p3222_p8), [#allocation2], %s2598_s23 }
  0x33   : > { %3075 = dma.done.wait (%p3209_p4), %s363_s15, 4096  }
  0x34   : > { %3077 = vsyncadd (%p3209_p4), %s363_s15, 4294963200 }
  0x35   : > { %3079 = dma.done.wait (%p48_p1), [#allocation6], 1280  }
  0x36   : > { %3081 = vsyncadd (%p48_p1), [#allocation6], 4294966016  ;;  %vm447_vm0 = vcmask 523264   ;;  %v417_v0 = vld [vmem:[%s3288_s28 + $0x10] sm:$0xff]  ;;  %v415_v1 = vld [vmem:[%s3288_s28] sm:$0xff]  ;;  %v3106_v14 = vmov 64.0  }
  0x37   : > { %v3301_v2 = vld [vmem:[%s3288_s28 + $0x20] sm:$0xff]  ;;  %v454_v3 = vsel %vm447_vm0, %v417_v0, 0.0  ;;  %v448_v4 = vsel %vm447_vm0, %v415_v1, 0.0  ;;  %v416_v6 = vld [vmem:[%s3288_s28 + $0x8] sm:$0xff]  ;;  %v418_v7 = vld [vmem:[%s3288_s28 + $0x18] sm:$0xff]  ;;  %2836 = vrcp.f32 %v3106_v14  ;;  %s3110_s26 = smov 20  }
  0x38   : > { %v460_v5 = vsel %vm447_vm0, %v3301_v2, 0.0  ;;  %455 = vadd.xlane.f32.xlu1 %v454_v3  ;;  %449 = vadd.xlane.f32.xlu0 %v448_v4  ;;  %v420_v8 = vld [vmem:[%s3288_s28 + $0x28] sm:$0xff]  ;;  %v451_v9 = vsel %vm447_vm0, %v416_v6, 0.0  ;;  %v457_v10 = vsel %vm447_vm0, %v418_v7, 0.0  ;;  %v421_v12 = vld [vmem:[%s3288_s28 + $0x30] sm:$0xff]  ;;  %v3336_v39 = vld [vmem:[%s3288_s28 + $0x38] sm:$0xff] }
  0x39   : > { %461 = vadd.xlane.f32.xlu2 %v460_v5  ;;  %v463_v11 = vsel %vm447_vm0, %v420_v8, 0.0  ;;  %v466_v13 = vsel %vm447_vm0, %v421_v12, 0.0  ;;  %v3331_v36 = vld [vmem:[%s3288_s28 + $0x48] sm:$0xff]  ;;  %v469_v44 = vsel %vm447_vm0, %v3336_v39, 0.0  ;;  %v3357_v50 = vld [vmem:[%s3288_s28 + $0x40] sm:$0xff]  ;;  %v3371_v58 = vld [vmem:[%s3288_s28 + $0x50] sm:$0xff] }
  0x3a   : > { %v475_v41 = vsel %vm447_vm0, %v3331_v36, 0.0  ;;  %v472_v54 = vsel %vm447_vm0, %v3357_v50, 0.0  ;;  %v3368_v57 = vld [vmem:[%s3288_s28 + $0x60] sm:$0xff]  ;;  %v478_v62 = vsel %vm447_vm0, %v3371_v58, 0.0  ;;  %v3391_v4 = vld [vmem:[%s3288_s28 + $0x68] sm:$0xff]  ;;  %s3111_s18 = smov 12  }
  0x3b   : > { %v484_v60 = vsel %vm447_vm0, %v3368_v57, 0.0  ;;  %v487_v5 = vsel %vm447_vm0, %v3391_v4, 0.0  ;;  %s3112_s23 = smov 8   ;;  %s3113_s15 = smov 24  }
  0x3c   : > { %s3114_s5 = smov 4   ;;  %s3115_s8 = smov 16  }
  0x3d   : > { %v2837_v15 = vpop.eup %2836  ;;  %s3116_s19 = smov 44   ;;  %s3117_s24 = smov 36  }
  0x3e   : > { %v545_v16 = vmul.f32 64.0, %v2837_v15  ;;  %vm549_vm1 = vweird.f32 %v2837_v15  ;;  %s3118_s25 = smov 40   ;;  %s3119_s22 = smov 48  }
  0x3f   : > { %s3120_s30 = smov 32   ;;  %s3121_s11 = smov 52  }
  0x40   : > { %452 = vadd.xlane.f32.xlu0 %v451_v9  ;;  %458 = vadd.xlane.f32.xlu1 %v457_v10  ;;  %v546_v17 = vsub.f32 1.0, %v545_v16  ;;  %v1235_v9 = vld [vmem:[%s4690_s3 + $0x20] sm:$0xff]  ;;  %v1234_v10 = vld [vmem:[%s4690_s3 + $0x18] sm:$0xff]  ;;  %s3122_s12 = smov 60  }
  0x41   : > { %464 = vadd.xlane.f32.xlu2 %v463_v11  ;;  %v1233_v11 = vld [vmem:[%s4690_s3 + $0x10] sm:$0xff] }
  0x42   : > { %v547_v18 = vmul.f32 %v2837_v15, %v546_v17 }
  0x44   : > { %v548_v19 = vadd.f32 %v2837_v15, %v547_v18 }
  0x46   : > { %v3315_v20 = vsel %vm549_vm1, %v2837_v15, %v548_v19 }
  0x48   : > { %467 = vadd.xlane.f32.xlu1 %v466_v13  ;;  %v1231_v13 = vld [vmem:[%s4690_s3] sm:$0xff] }
  0xab   : > { %v456_v21 = vpop.xlane.xlu1 %455  ;;  %v450_v22 = vpop.xlane.xlu0 %449 }
  0xac   : > { %v553_v23 = vmul.f32 %v3315_v20, %v456_v21  ;;  %v551_v24 = vmul.f32 %v3315_v20, %v450_v22  ;;  %v462_v25 = vpop.xlane.xlu2 %461 }
  0xad   : > { %v555_v49 = vmul.f32 %v3315_v20, %v462_v25 }
  0xae   : > { %v3319_v26 = vsub.f32 %v417_v0, %v553_v23  ;;  %v3321_v27 = vsub.f32 %v415_v1, %v551_v24  ;;  %v3385_v1 = vld [vmem:[%s3288_s28 + $0x58] sm:$0xff] }
  0xaf   : > { %v3362_v53 = vsub.f32 %v3301_v2, %v555_v49  ;;  %v481_v3 = vsel %vm447_vm0, %v3385_v1, 0.0 }
  0xb0   : > { %v617_v28 = vmul.f32 %v3319_v26, %v3319_v26  ;;  %v615_v29 = vmul.f32 %v3321_v27, %v3321_v27 }
  0xb1   : > { %v619_v59 = vmul.f32 %v3362_v53, %v3362_v53 }
  0xb2   : > { %v653_v30 = vsel %vm447_vm0, %v617_v28, 0.0  ;;  %v647_v31 = vsel %vm447_vm0, %v615_v29, 0.0 }
  0xb3   : > { %654 = vadd.xlane.f32.xlu1 %v653_v30  ;;  %648 = vadd.xlane.f32.xlu0 %v647_v31  ;;  %v453_v32 = vpop.xlane.xlu0 %452  ;;  %v459_v33 = vpop.xlane.xlu1 %458  ;;  %v659_v63 = vsel %vm447_vm0, %v619_v59, 0.0 }
  0xb4   : > { %v552_v34 = vmul.f32 %v3315_v20, %v453_v32  ;;  %v465_v35 = vpop.xlane.xlu2 %464  ;;  %v554_v37 = vmul.f32 %v3315_v20, %v459_v33 }
  0xb5   : > { %v556_v38 = vmul.f32 %v3315_v20, %v465_v35 }
  0xb6   : > { %v3338_v40 = vsub.f32 %v416_v6, %v552_v34  ;;  %v3344_v43 = vsub.f32 %v418_v7, %v554_v37  ;;  %v1238_v6 = vld [vmem:[%s4690_s3 + $0x38] sm:$0xff]  ;;  %v1237_v7 = vld [vmem:[%s4690_s3 + $0x30] sm:$0xff] }
  0xb7   : > { %v3342_v42 = vsub.f32 %v420_v8, %v556_v38  ;;  %1347 = vmatpush.msra.mxu0 %v1238_v6  ;;  %2720 = vmatpush.msra.mxu3 %v1238_v6  ;;  %v1236_v8 = vld [vmem:[%s4690_s3 + $0x28] sm:$0xff]  ;;  %v3470_v6 = vld [vmem:[%s4688_s1] ss:$0 sm:$0xff] }
  0xb8   : > { %v616_v45 = vmul.f32 %v3338_v40, %v3338_v40  ;;  %v618_v48 = vmul.f32 %v3344_v43, %v3344_v43 }
  0xb9   : > { %v620_v47 = vmul.f32 %v3342_v42, %v3342_v42  ;;  %1348 = vmatpush.msra.mxu0 %v1237_v7  ;;  %2721 = vmatpush.msra.mxu3 %v1237_v7 }
  0xba   : > { %v650_v46 = vsel %vm447_vm0, %v616_v45, 0.0  ;;  %v656_v52 = vsel %vm447_vm0, %v618_v48, 0.0 }
  0xbb   : > { %476 = vadd.xlane.f32.xlu1 %v475_v41  ;;  %470 = vadd.xlane.f32.xlu0 %v469_v44  ;;  %v662_v51 = vsel %vm447_vm0, %v620_v47, 0.0  ;;  %v468_v55 = vpop.xlane.xlu1 %467 }
  0xbc   : > { %651 = vadd.xlane.f32.xlu2 %v650_v46  ;;  %v557_v56 = vmul.f32 %v3315_v20, %v468_v55  ;;  %1349 = vmatpush.msra.mxu0 %v1236_v8 }
  0xbd   : > { %2722 = vmatpush.msra.mxu3 %v1236_v8 }
  0xbe   : > { %v3377_v61 = vsub.f32 %v421_v12, %v557_v56  ;;  %1350 = vmatpush.msra.mxu0 %v1235_v9  ;;  %v1232_v12 = vld [vmem:[%s4690_s3 + $0x8] sm:$0xff] }
  0xbf   : > { %2723 = vmatpush.msra.mxu3 %v1235_v9 }
  0xc0   : > { %v621_v0 = vmul.f32 %v3377_v61, %v3377_v61  ;;  %1351 = vmatpush.msra.mxu0 %v1234_v10 }
  0xc1   : > { %2724 = vmatpush.msra.mxu3 %v1234_v10 }
  0xc2   : > { %v665_v2 = vsel %vm447_vm0, %v621_v0, 0.0  ;;  %1352 = vmatpush.msra.mxu0 %v1233_v11 }
  0xc3   : > { %663 = vadd.xlane.f32.xlu1 %v662_v51  ;;  %657 = vadd.xlane.f32.xlu0 %v656_v52  ;;  %v3449_v51 = vld [vmem:[%s3288_s28 + $0x80] sm:$0xff] }
  0xc4   : > { %473 = vadd.xlane.f32.xlu2 %v472_v54  ;;  %2725 = vmatpush.msra.mxu3 %v1233_v11  ;;  %v3453_v54 = vld [vmem:[%s3288_s28 + $0x70] sm:$0xff]  ;;  %v496_v0 = vsel %vm447_vm0, %v3449_v51, 0.0 }
  0xc5   : > { %1353 = vmatpush.msra.mxu0 %v1232_v12 }
  0xc6   : > { %2726 = vmatpush.msra.mxu3 %v1232_v12 }
  0xc7   : > { %1354 = vmatpush.msra.mxu0 %v1231_v13 }
  0xc8   : > { %2727 = vmatpush.msra.mxu3 %v1231_v13 }
  0xcb   : > { %485 = vadd.xlane.f32.xlu1 %v484_v60  ;;  %479 = vadd.xlane.f32.xlu0 %v478_v62 }
  0xcc   : > { %660 = vadd.xlane.f32.xlu2 %v659_v63 }
  0xd3   : > { %666 = vadd.xlane.f32.xlu0 %v665_v2 }
  0xd4   : > { %482 = vadd.xlane.f32.xlu2 %v481_v3 }
  0xdb   : > { %488 = vadd.xlane.f32.xlu0 %v487_v5  ;;  %v490_v5 = vsel %vm447_vm0, %v3453_v54, 0.0 }
 0x126   : > { %v655_v14 = vpop.xlane.xlu1 %654  ;;  %v649_v15 = vpop.xlane.xlu0 %648 }
 0x127   : > { %v745_v16 = vmul.f32 %v655_v14, %v3315_v20  ;;  %v743_v17 = vmul.f32 %v649_v15, %v3315_v20  ;;  %v3481_v14 = vld [vmem:[%s4689_s2] ss:$0 sm:$0xff] }
 0x129   : > { %v3421_v18 = vadd.f32 1e-05, %v745_v16  ;;  %v775_v19 = vadd.f32 1e-05, %v743_v17 }
 0x12b   : > { %2838 = vrsqrt.f32 %v3421_v18  ;;  %vm813_vm3 = vweird.f32 %v775_v19  ;;  %vm833_vm5 = vweird.f32 %v3421_v18 }
 0x12c   : > { %2840 = vrsqrt.f32 %v775_v19 }
 0x12e   : > { %v477_v21 = vpop.xlane.xlu1 %476  ;;  %v471_v22 = vpop.xlane.xlu0 %470 }
 0x12f   : > { %v560_v23 = vmul.f32 %v3315_v20, %v477_v21  ;;  %v652_v24 = vpop.xlane.xlu2 %651  ;;  %v558_v25 = vmul.f32 %v3315_v20, %v471_v22 }
 0x130   : > { %v744_v28 = vmul.f32 %v652_v24, %v3315_v20 }
 0x131   : > { %v3427_v29 = vpop.eup %2838  ;;  %v3430_v30 = vsub.f32 %v3331_v36, %v560_v23  ;;  %v3433_v31 = vsub.f32 %v3336_v39, %v558_v25 }
 0x132   : > { %v2841_v32 = vpop.eup %2840  ;;  %v828_v33 = vmul.f32 %v3427_v29, %v3421_v18  ;;  %v3437_v34 = vadd.f32 1e-05, %v744_v28  ;;  %vm834_vm6 = vweird.f32 %v3427_v29 }
 0x133   : > { %v808_v35 = vmul.f32 %v2841_v32, %v775_v19  ;;  %v624_v37 = vmul.f32 %v3430_v30, %v3430_v30  ;;  %v622_v38 = vmul.f32 %v3433_v31, %v3433_v31  ;;  %vm814_vm2 = vweird.f32 %v2841_v32  ;;  %vm3507_vm8 = vmor %vm833_vm5, %vm834_vm6 }
 0x134   : > { %2842 = vrsqrt.f32 %v3437_v34  ;;  %v829_v44 = vmul.f32 %v3427_v29, %v828_v33  ;;  %vm815_vm4 = vmor %vm813_vm3, %vm814_vm2  ;;  %vm823_vm9 = vweird.f32 %v3437_v34 }
 0x135   : > { %v809_v36 = vmul.f32 %v2841_v32, %v808_v35  ;;  %v674_v39 = vsel %vm447_vm0, %v624_v37, 0.0  ;;  %v668_v41 = vsel %vm447_vm0, %v622_v38, 0.0  ;;  %v3503_v37 = vld [vmem:[%s3288_s28 + $0x78] sm:$0xff] }
 0x136   : > { %v664_v45 = vpop.xlane.xlu1 %663  ;;  %675 = vadd.xlane.f32.xlu0 %v674_v39  ;;  %669 = vadd.xlane.f32.xlu2 %v668_v41  ;;  %v658_v46 = vpop.xlane.xlu0 %657  ;;  %v830_v62 = vmul.f32 0.5, %v829_v44  ;;  %v493_v44 = vsel %vm447_vm0, %v3503_v37, 0.0 }
 0x137   : > { %v810_v47 = vmul.f32 0.5, %v809_v36  ;;  %v474_v48 = vpop.xlane.xlu2 %473  ;;  %v746_v49 = vmul.f32 %v658_v46, %v3315_v20  ;;  %v748_v56 = vmul.f32 %v664_v45, %v3315_v20 }
 0x138   : > { %v559_v52 = vmul.f32 %v3315_v20, %v474_v48  ;;  %v831_v10 = vsub.f32 1.5, %v830_v62 }
 0x139   : > { %v811_v55 = vsub.f32 1.5, %v810_v47  ;;  %v3456_v59 = vadd.f32 1e-05, %v746_v49  ;;  %v3472_v8 = vadd.f32 1e-05, %v748_v56 }
 0x13a   : > { %v2843_v60 = vpop.eup %2842  ;;  %v3459_v63 = vsub.f32 %v3357_v50, %v559_v52 }
 0x13b   : > { %v812_v2 = vmul.f32 %v2841_v32, %v811_v55  ;;  %v818_v3 = vmul.f32 %v2843_v60, %v3437_v34  ;;  %2844 = vrsqrt.f32 %v3456_v59  ;;  %vm824_vm7 = vweird.f32 %v2843_v60 }
 0x13c   : > { %v623_v9 = vmul.f32 %v3459_v63, %v3459_v63  ;;  %2846 = vrsqrt.f32 %v3472_v8  ;;  %vm825_vm10 = vmor %vm823_vm9, %vm824_vm7  ;;  %vm843_vm11 = vweird.f32 %v3456_v59  ;;  %vm863_vm2 = vweird.f32 %v3472_v8 }
 0x13d   : > { %v816_v50 = vsel %vm815_vm4, %v2841_v32, %v812_v2  ;;  %v819_v7 = vmul.f32 %v2843_v60, %v818_v3  ;;  %v832_v32 = vmul.f32 %v3427_v29, %v831_v10 }
 0x13e   : > { %v486_v11 = vpop.xlane.xlu1 %485  ;;  %497 = vadd.xlane.f32.xlu0 %v496_v0  ;;  %491 = vadd.xlane.f32.xlu2 %v490_v5  ;;  %v480_v12 = vpop.xlane.xlu0 %479  ;;  %v1127_v13 = vmul.f32 %v816_v50, %v3321_v27  ;;  %v671_v17 = vsel %vm447_vm0, %v623_v9, 0.0 }
 0x13f   : > { %v820_v15 = vmul.f32 0.5, %v819_v7  ;;  %v563_v16 = vmul.f32 %v3315_v20, %v486_v11  ;;  %v661_v19 = vpop.xlane.xlu2 %660  ;;  %v561_v21 = vmul.f32 %v3315_v20, %v480_v12  ;;  %672 = vadd.xlane.f32.xlu1 %v671_v17  ;;  %v836_v45 = vsel %vm3507_vm8, %v3427_v29, %v832_v32 }
 0x140   : > { %v747_v27 = vmul.f32 %v661_v19, %v3315_v20  ;;  %v1163_v22 = vmul.f32 %v3470_v6, %v1127_v13  ;;  %v1129_v3 = vmul.f32 %v836_v45, %v3319_v26  ;;  %v3595_v45 = vld [vmem:[%s3288_s28 + $0xa0] sm:$0xff] }
 0x141   : > { %v821_v23 = vsub.f32 1.5, %v820_v15  ;;  %v3491_v24 = vsub.f32 %v3368_v57, %v563_v16  ;;  %v3494_v25 = vsub.f32 %v3371_v58, %v561_v21  ;;  %v3496_v28 = vpop.eup %2844 }
 0x142   : > { %v3499_v33 = vadd.f32 1e-05, %v747_v27  ;;  %v1199_v35 = vadd.f32 %v3481_v14, %v1163_v22  ;;  %v838_v58 = vmul.f32 %v3496_v28, %v3456_v59  ;;  %v3530_v49 = vpop.eup %2846  ;;  %vm844_vm12 = vweird.f32 %v3496_v28 }
 0x143   : > { %v822_v57 = vmul.f32 %v2843_v60, %v821_v23  ;;  %v627_v36 = vmul.f32 %v3491_v24, %v3491_v24  ;;  %v625_v18 = vmul.f32 %v3494_v25, %v3494_v25  ;;  %v858_v50 = vmul.f32 %v3530_v49, %v3472_v8  ;;  %vm3564_vm13 = vmor %vm843_vm11, %vm844_vm12 }
 0x144   : > { %2848 = vrsqrt.f32 %v3499_v33  ;;  %2602 = vmatmul.msk.f32.vlgmr.msra.gmra.mxu0 %vm447_vm0, %v1199_v35  ;;  %v839_v41 = vmul.f32 %v3496_v28, %v838_v58  ;;  %v1165_v19 = vmul.f32 %v3470_v6, %v1129_v3  ;;  %vm853_vm14 = vweird.f32 %v3499_v33 }
 0x145   : > { %v826_v39 = vsel %vm825_vm10, %v2843_v60, %v822_v57  ;;  %v683_v34 = vsel %vm447_vm0, %v627_v36, 0.0  ;;  %v677_v46 = vsel %vm447_vm0, %v625_v18, 0.0  ;;  %v3534_v60 = vld [vmem:[%s3288_s28 + $0x98] sm:$0xff]  ;;  %v859_v21 = vmul.f32 %v3530_v49, %v858_v50  ;;  %v3581_v57 = vld [vmem:[%s3288_s28 + $0x90] sm:$0xff] }
 0x146   : > { %684 = vadd.xlane.f32.xlu0 %v683_v34  ;;  %v667_v47 = vpop.xlane.xlu0 %666  ;;  %v1128_v48 = vmul.f32 %v826_v39, %v3338_v40  ;;  %v840_v52 = vmul.f32 0.5, %v839_v41  ;;  %678 = vadd.xlane.f32.xlu2 %v677_v46  ;;  %v3542_v40 = vld [vmem:[%s3288_s28 + $0x88] sm:$0xff]  ;;  %v505_v10 = vsel %vm447_vm0, %v3534_v60, 0.0  ;;  %v1201_v38 = vadd.f32 %v3481_v14, %v1165_v19 }
 0x147   : > { %v483_v55 = vpop.xlane.xlu2 %482  ;;  %v749_v56 = vmul.f32 %v667_v47, %v3315_v20  ;;  %494 = vadd.xlane.f32.xlu1 %v493_v44  ;;  %vm864_vm3 = vweird.f32 %v3530_v49 }
 0x148   : > { %v562_v62 = vmul.f32 %v3315_v20, %v483_v55  ;;  %v1164_v29 = vmul.f32 %v3470_v6, %v1128_v48  ;;  %v841_v0 = vsub.f32 1.5, %v840_v52  ;;  %vm865_vm4 = vmor %vm863_vm2, %vm864_vm3  ;;  %v508_v55 = vsel %vm447_vm0, %v3595_v45, 0.0 }
 0x149   : > { %v3539_v2 = vadd.f32 1e-05, %v749_v56 }
 0x14a   : > { %v2849_v5 = vpop.eup %2848  ;;  %v3548_v7 = vsub.f32 %v3385_v1, %v562_v62  ;;  %v1200_v9 = vadd.f32 %v3481_v14, %v1164_v29  ;;  %v842_v11 = vmul.f32 %v3496_v28, %v841_v0  ;;  %v499_v1 = vsel %vm447_vm0, %v3542_v40, 0.0 }
 0x14b   : > { %v848_v12 = vmul.f32 %v2849_v5, %v3499_v33  ;;  %2850 = vrsqrt.f32 %v3539_v2  ;;  %vm854_vm15 = vweird.f32 %v2849_v5  ;;  %vm873_vm5 = vweird.f32 %v3539_v2 }
 0x14c   : > { %2603 = vmatmul.msk.f32.gmra.mxu0 %vm447_vm0, %v1200_v9  ;;  %v626_v26 = vmul.f32 %v3548_v7, %v3548_v7  ;;  %v846_v27 = vsel %vm3564_vm13, %v3496_v28, %v842_v11  ;;  %v860_v28 = vmul.f32 0.5, %v859_v21  ;;  %vm855_vm1 = vmor %vm853_vm14, %vm854_vm15  ;;  %v1489_v11 = vld [vmem:[#allocation5 + $0x28] sm:$0xff] }
 0x14d   : > { %v849_v13 = vmul.f32 %v2849_v5, %v848_v12  ;;  %v1130_v58 = vmul.f32 %v846_v27, %v3344_v43  ;;  %v1488_v12 = vld [vmem:[#allocation5 + $0x20] sm:$0xff] }
 0x14e   : > { %v680_v16 = vsel %vm447_vm0, %v626_v26, 0.0  ;;  %v489_v17 = vpop.xlane.xlu0 %488  ;;  %506 = vadd.xlane.f32.xlu0 %v505_v10  ;;  %500 = vadd.xlane.f32.xlu2 %v499_v1  ;;  %v861_v34 = vsub.f32 1.5, %v860_v28  ;;  %v1490_v10 = vld [vmem:[#allocation5 + $0x30] sm:$0xff]  ;;  %v1485_v1 = vld [vmem:[#allocation5 + $0x8] sm:$0xff] }
 0x14f   : > { %v850_v22 = vmul.f32 0.5, %v849_v13  ;;  %v564_v59 = vmul.f32 %v3315_v20, %v489_v17  ;;  %681 = vadd.xlane.f32.xlu1 %v680_v16  ;;  %v1166_v41 = vmul.f32 %v3470_v6, %v1130_v58  ;;  %v1486_v26 = vld [vmem:[#allocation5 + $0x10] sm:$0xff]  ;;  %v1484_v13 = vld [vmem:[#allocation5] sm:$0xff] }
 0x150   : > { %v862_v48 = vmul.f32 %v3530_v49, %v861_v34 }
 0x151   : > { %v2851_v23 = vpop.eup %2850  ;;  %v851_v32 = vsub.f32 1.5, %v850_v22  ;;  %v3577_v35 = vsub.f32 %v3391_v4, %v564_v59  ;;  %v502_v4 = vsel %vm447_vm0, %v3581_v57, 0.0  ;;  %v1202_v46 = vadd.f32 %v3481_v14, %v1166_v41 }
 0x152   : > { %v868_v18 = vmul.f32 %v2851_v23, %v3539_v2  ;;  %v866_v8 = vsel %vm865_vm4, %v3530_v49, %v862_v48  ;;  %vm874_vm6 = vweird.f32 %v2851_v23 }
 0x153   : > { %v852_v36 = vmul.f32 %v2849_v5, %v851_v32  ;;  %v628_v39 = vmul.f32 %v3577_v35, %v3577_v35  ;;  %v1132_v29 = vmul.f32 %v866_v8, %v3342_v42  ;;  %vm875_vm7 = vmor %vm873_vm5, %vm874_vm6  ;;  %v1491_v42 = vld [vmem:[#allocation5 + $0x38] sm:$0xff] }
 0x154   : > { %2604 = vmatmul.msk.f32.gmra.mxu0 %vm447_vm0, %v1201_v38  ;;  %v869_v44 = vmul.f32 %v2851_v23, %v868_v18  ;;  %1600 = vmatpush.msra.mxu1 %v1491_v42 }
 0x155   : > { %v686_v33 = vsel %vm447_vm0, %v628_v39, 0.0  ;;  %v856_v43 = vsel %vm855_vm1, %v2849_v5, %v852_v36  ;;  %v1168_v3 = vmul.f32 %v3470_v6, %v1132_v29  ;;  %2728 = vmatpush.msrb.mxu3 %v1491_v42 }
 0x156   : > { %687 = vadd.xlane.f32.xlu2 %v686_v33  ;;  %v1131_v47 = vmul.f32 %v856_v43, %v3362_v53  ;;  %v870_v52 = vmul.f32 0.5, %v869_v44  ;;  %1601 = vmatpush.msra.mxu1 %v1490_v10 }
 0x157   : > { %503 = vadd.xlane.f32.xlu1 %v502_v4  ;;  %v1204_v50 = vadd.f32 %v3481_v14, %v1168_v3  ;;  %2729 = vmatpush.msrb.mxu3 %v1490_v10 }
 0x158   : > { %v1167_v56 = vmul.f32 %v3470_v6, %v1131_v47  ;;  %v871_v62 = vsub.f32 1.5, %v870_v52  ;;  %1602 = vmatpush.msra.mxu1 %v1489_v11 }
 0x159   : > { %2730 = vmatpush.msrb.mxu3 %v1489_v11 }
 0x15a   : > { %v1203_v53 = vadd.f32 %v3481_v14, %v1167_v56  ;;  %v872_v0 = vmul.f32 %v2851_v23, %v871_v62  ;;  %1603 = vmatpush.msra.mxu1 %v1488_v12  ;;  %v3646_v62 = vld [vmem:[%s3288_s28 + $0xa8] sm:$0xff] }
 0x15b   : > { %2731 = vmatpush.msrb.mxu3 %v1488_v12 }
 0x15c   : > { %2605 = vmatmul.msk.f32.gmra.mxu0 %vm447_vm0, %v1202_v46  ;;  %v876_v5 = vsel %vm875_vm7, %v2851_v23, %v872_v0 }
 0x15d   : > { %v1133_v49 = vmul.f32 %v876_v5, %v3377_v61  ;;  %v1487_v61 = vld [vmem:[#allocation5 + $0x18] sm:$0xff] }
 0x15e   : > { %509 = vadd.xlane.f32.xlu2 %v508_v55  ;;  %1604 = vmatpush.msra.mxu1 %v1487_v61 }
 0x15f   : > { %v1169_v2 = vmul.f32 %v3470_v6, %v1133_v49  ;;  %2732 = vmatpush.msrb.mxu3 %v1487_v61 }
 0x160   : > { %1605 = vmatpush.msra.mxu1 %v1486_v26 }
 0x161   : > { %v1205_v9 = vadd.f32 %v3481_v14, %v1169_v2  ;;  %2733 = vmatpush.msrb.mxu3 %v1486_v26  ;;  %v3661_v2 = vld [vmem:[%s4691_s4] ss:$0 sm:$0xff] }
 0x162   : > { %1606 = vmatpush.msra.mxu1 %v1485_v1 }
 0x163   : > { %2734 = vmatpush.msrb.mxu3 %v1485_v1 }
 0x164   : > { %2606 = vmatmul.msk.f32.gmra.mxu0 %vm447_vm0, %v1203_v53  ;;  %1607 = vmatpush.msra.mxu1 %v1484_v13  ;;  %v3649_v53 = vld [vmem:[%s3288_s28 + $0xb8] sm:$0xff] }
 0x165   : > { %2735 = vmatpush.msrb.mxu3 %v1484_v13  ;;  %v517_v42 = vsel %vm447_vm0, %v3649_v53, 0.0 }
 0x16c   : > { %2607 = vmatmul.msk.f32.gmra.mxu0 %vm447_vm0, %v1204_v50 }
 0x174   : > { %2608 = vmatmul.msk.f32.gmra.mxu0 %vm447_vm0, %v1205_v9  ;;  %v511_v9 = vsel %vm447_vm0, %v3646_v62, 0.0 }
 0x1a9   : > { %v670_v15 = vpop.xlane.xlu2 %669  ;;  %v676_v16 = vpop.xlane.xlu0 %675 }
 0x1aa   : > { %v750_v17 = vmul.f32 %v670_v15, %v3315_v20  ;;  %v752_v19 = vmul.f32 %v676_v16, %v3315_v20 }
 0x1ac   : > { %v782_v21 = vadd.f32 1e-05, %v750_v17  ;;  %v3618_v27 = vadd.f32 1e-05, %v752_v19 }
 0x1ae   : > { %2852 = vrsqrt.f32 %v782_v21  ;;  %vm883_vm9 = vweird.f32 %v782_v21  ;;  %vm903_vm11 = vweird.f32 %v3618_v27 }
 0x1af   : > { %2854 = vrsqrt.f32 %v3618_v27 }
 0x1b1   : > { %v492_v22 = vpop.xlane.xlu2 %491  ;;  %v498_v59 = vpop.xlane.xlu0 %497 }
 0x1b2   : > { %v565_v23 = vmul.f32 %v3315_v20, %v492_v22  ;;  %v567_v32 = vmul.f32 %v3315_v20, %v498_v59  ;;  %v673_v38 = vpop.xlane.xlu1 %672 }
 0x1b3   : > { %v751_v28 = vmul.f32 %v673_v38, %v3315_v20 }
 0x1b4   : > { %v2853_v58 = vpop.eup %2852  ;;  %v3625_v36 = vsub.f32 %v3453_v54, %v565_v23  ;;  %v3628_v18 = vsub.f32 %v3449_v51, %v567_v32  ;;  %v3680_v23 = vld [vmem:[%s3288_s28 + $0xe0] sm:$0xff] }
 0x1b5   : > { %v3630_v39 = vpop.eup %2854  ;;  %v878_v4 = vmul.f32 %v2853_v58, %v782_v21  ;;  %v3632_v33 = vadd.f32 1e-05, %v751_v28  ;;  %vm884_vm8 = vweird.f32 %v2853_v58 }
 0x1b6   : > { %v629_v41 = vmul.f32 %v3625_v36, %v3625_v36  ;;  %v898_v43 = vmul.f32 %v3630_v39, %v3618_v27  ;;  %v631_v54 = vmul.f32 %v3628_v18, %v3628_v18  ;;  %vm885_vm10 = vmor %vm883_vm9, %vm884_vm8  ;;  %vm904_vm12 = vweird.f32 %v3630_v39 }
 0x1b7   : > { %v879_v34 = vmul.f32 %v2853_v58, %v878_v4  ;;  %2856 = vrsqrt.f32 %v3632_v33  ;;  %vm3707_vm14 = vmor %vm903_vm11, %vm904_vm12  ;;  %vm893_vm15 = vweird.f32 %v3632_v33 }
 0x1b8   : > { %v689_v51 = vsel %vm447_vm0, %v629_v41, 0.0  ;;  %v695_v46 = vsel %vm447_vm0, %v631_v54, 0.0  ;;  %v899_v55 = vmul.f32 %v3630_v39, %v898_v43 }
 0x1b9   : > { %v880_v44 = vmul.f32 0.5, %v879_v34  ;;  %690 = vadd.xlane.f32.xlu1 %v689_v51  ;;  %v679_v47 = vpop.xlane.xlu2 %678  ;;  %696 = vadd.xlane.f32.xlu2 %v695_v46  ;;  %v685_v48 = vpop.xlane.xlu0 %684  ;;  %v3692_v34 = vld [vmem:[%s3288_s28 + $0xb0] sm:$0xff]  ;;  %v532_v51 = vsel %vm447_vm0, %v3680_v23, 0.0 }
 0x1ba   : > { %v495_v56 = vpop.xlane.xlu1 %494  ;;  %v753_v8 = vmul.f32 %v679_v47, %v3315_v20  ;;  %v755_v5 = vmul.f32 %v685_v48, %v3315_v20  ;;  %v900_v11 = vmul.f32 0.5, %v899_v55  ;;  %v514_v27 = vsel %vm447_vm0, %v3692_v34, 0.0 }
 0x1bb   : > { %v881_v52 = vsub.f32 1.5, %v880_v44  ;;  %v566_v29 = vmul.f32 %v3315_v20, %v495_v56 }
 0x1bc   : > { %v3652_v3 = vadd.f32 1e-05, %v753_v8  ;;  %v3672_v1 = vadd.f32 1e-05, %v755_v5  ;;  %v901_v21 = vsub.f32 1.5, %v900_v11 }
 0x1bd   : > { %v882_v0 = vmul.f32 %v2853_v58, %v881_v52  ;;  %v2857_v50 = vpop.eup %2856  ;;  %v3656_v49 = vsub.f32 %v3503_v37, %v566_v29 }
 0x1be   : > { %v888_v12 = vmul.f32 %v2857_v50, %v3632_v33  ;;  %2858 = vrsqrt.f32 %v3652_v3  ;;  %vm894_vm13 = vweird.f32 %v2857_v50  ;;  %v902_v44 = vmul.f32 %v3630_v39, %v901_v21 }
 0x1bf   : > { %v886_v10 = vsel %vm885_vm10, %v2853_v58, %v882_v0  ;;  %v630_v37 = vmul.f32 %v3656_v49, %v3656_v49  ;;  %2860 = vrsqrt.f32 %v3672_v1  ;;  %vm895_vm1 = vmor %vm893_vm15, %vm894_vm13  ;;  %vm913_vm2 = vweird.f32 %v3652_v3 }
 0x1c0   : > { %v1134_v61 = vmul.f32 %v886_v10, %v3433_v31  ;;  %v889_v26 = vmul.f32 %v2857_v50, %v888_v12  ;;  %vm933_vm8 = vweird.f32 %v3672_v1 }
 0x1c1   : > { %v1356_v13 = vpop.f32.mrf.mxu0  ;;  %512 = vadd.xlane.f32.xlu1 %v511_v9  ;;  %v692_v16 = vsel %vm447_vm0, %v630_v37, 0.0  ;;  %v501_v17 = vpop.xlane.xlu2 %500  ;;  %518 = vadd.xlane.f32.xlu2 %v517_v42  ;;  %v3722_v9 = vld [vmem:[%s3288_s28 + $0xc0] sm:$0xff]  ;;  %v3725_v42 = vld [vmem:[%s3288_s28 + $0xe8] sm:$0xff] }
 0x1c2   : > { %v1357_v15 = vadd.f32 %v3661_v2, %v1356_v13  ;;  %v1170_v19 = vmul.f32 %v3470_v6, %v1134_v61  ;;  %v890_v22 = vmul.f32 0.5, %v889_v26  ;;  %693 = vadd.xlane.f32.xlu0 %v692_v16  ;;  %v682_v31 = vpop.xlane.xlu1 %681  ;;  %v568_v59 = vmul.f32 %v3315_v20, %v501_v17  ;;  %v507_v52 = vpop.xlane.xlu0 %506 }
 0x1c3   : > { %v754_v38 = vmul.f32 %v682_v31, %v3315_v20  ;;  %v570_v37 = vmul.f32 %v3315_v20, %v507_v52  ;;  %v520_v16 = vsel %vm447_vm0, %v3722_v9, 0.0 }
 0x1c4   : > { %v1452_v32 = vmax.f32 %v1357_v15, 0.0  ;;  %v1206_v58 = vadd.f32 %v3481_v14, %v1170_v19  ;;  %v3685_v28 = vpop.eup %2858  ;;  %v891_v4 = vsub.f32 1.5, %v890_v22  ;;  %v3689_v41 = vsub.f32 %v3542_v40, %v568_v59 }
 0x1c5   : > { %v908_v43 = vmul.f32 %v3685_v28, %v3652_v3  ;;  %v3696_v54 = vadd.f32 1e-05, %v754_v38  ;;  %v3727_v10 = vpop.eup %2860  ;;  %vm914_vm3 = vweird.f32 %v3685_v28  ;;  %v3762_v38 = vsub.f32 %v3534_v60, %v570_v37 }
 0x1c6   : > { %2634 = vmatmul.msk.f32.vlgmr.msra.gmra.mxu1 %vm447_vm0, %v1452_v32  ;;  %2609 = vmatmul.msk.f32.gmra.mxu0 %vm447_vm0, %v1206_v58  ;;  %v892_v46 = vmul.f32 %v2857_v50, %v891_v4  ;;  %v632_v47 = vmul.f32 %v3689_v41, %v3689_v41  ;;  %v928_v19 = vmul.f32 %v3727_v10, %v3672_v1  ;;  %vm3767_vm4 = vmor %vm913_vm2, %vm914_vm3  ;;  %vm934_vm9 = vweird.f32 %v3727_v10 }
 0x1c7   : > { %v909_v48 = vmul.f32 %v3685_v28, %v908_v43  ;;  %2862 = vrsqrt.f32 %v3696_v54  ;;  %v634_v52 = vmul.f32 %v3762_v38, %v3762_v38  ;;  %vm923_vm5 = vweird.f32 %v3696_v54  ;;  %vm3834_vm10 = vmor %vm933_vm8, %vm934_vm9 }
 0x1c8   : > { %v896_v55 = vsel %vm895_vm1, %v2857_v50, %v892_v46  ;;  %v698_v8 = vsel %vm447_vm0, %v632_v47, 0.0  ;;  %v906_v50 = vsel %vm3707_vm14, %v3630_v39, %v902_v44  ;;  %v535_v39 = vsel %vm447_vm0, %v3725_v42, 0.0  ;;  %v3779_v47 = vld [vmem:[%s3288_s28 + $0xc8] sm:$0xff] }
 0x1c9   : > { %v1359_v56 = vpop.f32.mrf.mxu0  ;;  %v910_v29 = vmul.f32 0.5, %v909_v48  ;;  %699 = vadd.xlane.f32.xlu1 %v698_v8  ;;  %v688_v0 = vpop.xlane.xlu2 %687  ;;  %v1135_v5 = vmul.f32 %v896_v55, %v3459_v63  ;;  %533 = vadd.xlane.f32.xlu2 %v532_v51  ;;  %v1136_v31 = vmul.f32 %v906_v50, %v3430_v30  ;;  %v929_v3 = vmul.f32 %v3727_v10, %v928_v19  ;;  %v3785_v55 = vld [vmem:[%s3288_s28 + $0xf0] sm:$0xff] }
 0x1ca   : > { %v1360_v33 = vadd.f32 %v3661_v2, %v1359_v56  ;;  %515 = vadd.xlane.f32.xlu0 %v514_v27  ;;  %v504_v11 = vpop.xlane.xlu1 %503  ;;  %v756_v12 = vmul.f32 %v688_v0, %v3315_v20 }
 0x1cb   : > { %v911_v61 = vsub.f32 1.5, %v910_v29  ;;  %v569_v63 = vmul.f32 %v3315_v20, %v504_v11  ;;  %v1171_v13 = vmul.f32 %v3470_v6, %v1135_v5  ;;  %v1172_v44 = vmul.f32 %v3470_v6, %v1136_v31  ;;  %v3884_v11 = vld [vmem:[%s4694_s7 + $0x28] sm:$0xff] }
 0x1cc   : > { %v1453_v26 = vmax.f32 %v1360_v33, 0.0  ;;  %v3737_v15 = vadd.f32 1e-05, %v756_v12  ;;  %v523_v29 = vsel %vm447_vm0, %v3779_v47, 0.0  ;;  %v930_v0 = vmul.f32 0.5, %v929_v3 }
 0x1cd   : > { %v3743_v17 = vpop.eup %2862  ;;  %v3748_v21 = vsub.f32 %v3581_v57, %v569_v63  ;;  %v1207_v22 = vadd.f32 %v3481_v14, %v1171_v13  ;;  %v912_v59 = vmul.f32 %v3685_v28, %v911_v61 }
 0x1ce   : > { %2635 = vmatmul.msk.f32.gmra.mxu1 %vm447_vm0, %v1453_v26  ;;  %v918_v32 = vmul.f32 %v3743_v17, %v3696_v54  ;;  %2864 = vrsqrt.f32 %v3737_v15  ;;  %vm924_vm6 = vweird.f32 %v3743_v17  ;;  %v538_v54 = vsel %vm447_vm0, %v3785_v55, 0.0 }
 0x1cf   : > { %2610 = vmatmul.msk.f32.gmra.mxu0 %vm447_vm0, %v1207_v22  ;;  %v633_v57 = vmul.f32 %v3748_v21, %v3748_v21  ;;  %v916_v60 = vsel %vm3767_vm4, %v3685_v28, %v912_v59  ;;  %v1208_v28 = vadd.f32 %v3481_v14, %v1172_v44  ;;  %vm3801_vm7 = vmor %vm923_vm5, %vm924_vm6  ;;  %v931_v63 = vsub.f32 1.5, %v930_v0  ;;  %v3822_v22 = vld [vmem:[%s3288_s28 + $0xf8] sm:$0xff] }
 0x1d0   : > { %v919_v30 = vmul.f32 %v3743_v17, %v918_v32  ;;  %v1137_v33 = vmul.f32 %v916_v60, %v3494_v25  ;;  %v704_v25 = vsel %vm447_vm0, %v634_v52, 0.0  ;;  %v3846_v60 = vld [vmem:[%s3288_s28 + $0xd8] sm:$0xff]  ;;  %vm943_vm11 = vweird.f32 %v3737_v15 }
 0x1d1   : > { %v1362_v58 = vpop.f32.mrf.mxu0  ;;  %v701_v51 = vsel %vm447_vm0, %v633_v57, 0.0  ;;  %521 = vadd.xlane.f32.xlu1 %v520_v16  ;;  %v510_v40 = vpop.xlane.xlu2 %509  ;;  %536 = vadd.xlane.f32.xlu2 %v535_v39  ;;  %v932_v59 = vmul.f32 %v3727_v10, %v931_v63  ;;  %v3914_v63 = vld [vmem:[%s4694_s7] sm:$0xff] }
 0x1d2   : > { %v1363_v43 = vadd.f32 %v3661_v2, %v1362_v58  ;;  %v920_v46 = vmul.f32 0.5, %v919_v30  ;;  %702 = vadd.xlane.f32.xlu0 %v701_v51  ;;  %v571_v27 = vmul.f32 %v3315_v20, %v510_v40  ;;  %v1173_v26 = vmul.f32 %v3470_v6, %v1137_v33 }
 0x1d3   : > { %v541_v30 = vsel %vm447_vm0, %v3822_v22, 0.0  ;;  %v936_v51 = vsel %vm3834_vm10, %v3727_v10, %v932_v59  ;;  %v529_v10 = vsel %vm447_vm0, %v3846_v60, 0.0 }
 0x1d4   : > { %v1454_v48 = vmax.f32 %v1363_v43, 0.0  ;;  %v3787_v56 = vpop.eup %2864  ;;  %v921_v8 = vsub.f32 1.5, %v920_v46  ;;  %v3807_v12 = vsub.f32 %v3595_v45, %v571_v27  ;;  %v3817_v45 = vld [vmem:[%s3288_s28 + $0xd0] sm:$0xff]  ;;  %v1209_v31 = vadd.f32 %v3481_v14, %v1173_v26  ;;  %v3908_v26 = vld [vmem:[%s4694_s7 + $0x8] sm:$0xff] }
 0x1d5   : > { %v938_v50 = vmul.f32 %v3787_v56, %v3737_v15  ;;  %v526_v57 = vsel %vm447_vm0, %v3817_v45, 0.0  ;;  %vm944_vm12 = vweird.f32 %v3787_v56  ;;  %v1139_v46 = vmul.f32 %v936_v51, %v3491_v24 }
 0x1d6   : > { %2636 = vmatmul.msk.f32.gmra.mxu1 %vm447_vm0, %v1454_v48  ;;  %v922_v5 = vmul.f32 %v3743_v17, %v921_v8  ;;  %v635_v19 = vmul.f32 %v3807_v12, %v3807_v12  ;;  %vm945_vm13 = vmor %vm943_vm11, %vm944_vm12 }
 0x1d7   : > { %2611 = vmatmul.msk.f32.gmra.mxu0 %vm447_vm0, %v1208_v28  ;;  %v939_v16 = vmul.f32 %v3787_v56, %v938_v50  ;;  %v1175_v15 = vmul.f32 %v3470_v6, %v1139_v46 }
 0x1d8   : > { %v926_v13 = vsel %vm3801_vm7, %v3743_v17, %v922_v5  ;;  %v707_v58 = vsel %vm447_vm0, %v635_v19, 0.0 }
 0x1d9   : > { %v1365_v37 = vpop.f32.mrf.mxu0  ;;  %524 = vadd.xlane.f32.xlu1 %v523_v29  ;;  %539 = vadd.xlane.f32.xlu2 %v538_v54  ;;  %v1138_v17 = vmul.f32 %v926_v13, %v3548_v7  ;;  %v940_v32 = vmul.f32 0.5, %v939_v16  ;;  %v1211_v24 = vadd.f32 %v3481_v14, %v1175_v15 }
 0x1da   : > { %v1366_v61 = vadd.f32 %v3661_v2, %v1365_v37  ;;  %705 = vadd.xlane.f32.xlu0 %v704_v25  ;;  %v3890_v25 = vld [vmem:[%s4694_s7 + $0x20] sm:$0xff]  ;;  %v3896_v37 = vld [vmem:[%s4694_s7 + $0x18] sm:$0xff] }
 0x1db   : > { %v1174_v43 = vmul.f32 %v3470_v6, %v1138_v17  ;;  %v941_v44 = vsub.f32 1.5, %v940_v32 }
 0x1dc   : > { %v1455_v39 = vmax.f32 %v1366_v61, 0.0  ;;  %v3902_v61 = vld [vmem:[%s4694_s7 + $0x10] sm:$0xff] }
 0x1dd   : > { %v1210_v3 = vadd.f32 %v3481_v14, %v1174_v43  ;;  %v942_v48 = vmul.f32 %v3787_v56, %v941_v44 }
 0x1de   : > { %2637 = vmatmul.msk.f32.gmra.mxu1 %vm447_vm0, %v1455_v39 }
 0x1df   : > { %2612 = vmatmul.msk.f32.gmra.mxu0 %vm447_vm0, %v1209_v31  ;;  %v946_v8 = vsel %vm945_vm13, %v3787_v56, %v942_v48  ;;  %v3872_v56 = vld [vmem:[%s4694_s7 + $0x38] sm:$0xff] }
 0x1e0   : > { %v1140_v29 = vmul.f32 %v946_v8, %v3577_v35  ;;  %1849 = vmatpush.msra.mxu2 %v3872_v56  ;;  %v3878_v35 = vld [vmem:[%s4694_s7 + $0x30] sm:$0xff] }
 0x1e1   : > { %v1368_v4 = vpop.f32.mrf.mxu0  ;;  %527 = vadd.xlane.f32.xlu1 %v526_v57  ;;  %542 = vadd.xlane.f32.xlu2 %v541_v30 }
 0x1e2   : > { %v1369_v7 = vadd.f32 %v3661_v2, %v1368_v4  ;;  %708 = vadd.xlane.f32.xlu0 %v707_v58  ;;  %v1176_v5 = vmul.f32 %v3470_v6, %v1140_v29  ;;  %1850 = vmatpush.msra.mxu2 %v3878_v35 }
 0x1e4   : > { %v1456_v40 = vmax.f32 %v1369_v7, 0.0  ;;  %v1212_v54 = vadd.f32 %v3481_v14, %v1176_v5  ;;  %1851 = vmatpush.msra.mxu2 %v3884_v11 }
 0x1e6   : > { %2638 = vmatmul.msk.f32.gmra.mxu1 %vm447_vm0, %v1456_v40  ;;  %1852 = vmatpush.msra.mxu2 %v3890_v25 }
 0x1e7   : > { %2613 = vmatmul.msk.f32.gmra.mxu0 %vm447_vm0, %v1210_v3 }
 0x1e8   : > { %1853 = vmatpush.msra.mxu2 %v3896_v37 }
 0x1e9   : > { %v1371_v27 = vpop.f32.mrf.mxu0  ;;  %530 = vadd.xlane.f32.xlu1 %v529_v10 }
 0x1ea   : > { %v1372_v52 = vadd.f32 %v3661_v2, %v1371_v27  ;;  %1854 = vmatpush.msra.mxu2 %v3902_v61 }
 0x1ec   : > { %v1457_v28 = vmax.f32 %v1372_v52, 0.0  ;;  %1855 = vmatpush.msra.mxu2 %v3908_v26 }
 0x1ee   : > { %2639 = vmatmul.msk.f32.gmra.mxu1 %vm447_vm0, %v1457_v28  ;;  %1856 = vmatpush.msra.mxu2 %v3914_v63 }
 0x1ef   : > { %2614 = vmatmul.msk.f32.gmra.mxu0 %vm447_vm0, %v1211_v24 }
 0x1f1   : > { %v1374_v33 = vpop.f32.mrf.mxu0 }
 0x1f2   : > { %v1375_v0 = vadd.f32 %v3661_v2, %v1374_v33 }
 0x1f4   : > { %v1458_v50 = vmax.f32 %v1375_v0, 0.0 }
 0x1f6   : > { %2640 = vmatmul.msk.f32.gmra.mxu1 %vm447_vm0, %v1458_v50 }
 0x1f7   : > { %2615 = vmatmul.msk.f32.gmra.mxu0 %vm447_vm0, %v1212_v54  ;;  %v3953_v54 = vld [vmem:[%s4693_s6] ss:$0 sm:$0xff] }
 0x22c   : > { %v691_v13 = vpop.xlane.xlu1 %690  ;;  %v697_v39 = vpop.xlane.xlu2 %696 }
 0x22d   : > { %v757_v16 = vmul.f32 %v691_v13, %v3315_v20  ;;  %v759_v19 = vmul.f32 %v697_v39, %v3315_v20 }
 0x22f   : > { %v789_v31 = vadd.f32 1e-05, %v757_v16  ;;  %v3919_v17 = vadd.f32 1e-05, %v759_v19 }
 0x231   : > { %2866 = vrsqrt.f32 %v789_v31  ;;  %vm953_vm15 = vweird.f32 %v789_v31  ;;  %vm973_vm2 = vweird.f32 %v3919_v17 }
 0x232   : > { %2868 = vrsqrt.f32 %v3919_v17 }
 0x234   : > { %v513_v59 = vpop.xlane.xlu1 %512  ;;  %v519_v57 = vpop.xlane.xlu2 %518 }
 0x235   : > { %v572_v32 = vmul.f32 %v3315_v20, %v513_v59  ;;  %v574_v30 = vmul.f32 %v3315_v20, %v519_v57  ;;  %v694_v1 = vpop.xlane.xlu0 %693 }
 0x236   : > { %v758_v7 = vmul.f32 %v694_v1, %v3315_v20 }
 0x237   : > { %v2867_v58 = vpop.eup %2866  ;;  %v3925_v4 = vsub.f32 %v3646_v62, %v572_v32  ;;  %v3931_v44 = vsub.f32 %v3649_v53, %v574_v30 }
 0x238   : > { %v3928_v43 = vpop.eup %2868  ;;  %v948_v51 = vmul.f32 %v2867_v58, %v789_v31  ;;  %v3935_v3 = vadd.f32 1e-05, %v758_v7  ;;  %vm954_vm14 = vweird.f32 %v2867_v58 }
 0x239   : > { %v968_v40 = vmul.f32 %v3928_v43, %v3919_v17  ;;  %v636_v46 = vmul.f32 %v3925_v4, %v3925_v4  ;;  %v638_v62 = vmul.f32 %v3931_v44, %v3931_v44  ;;  %vm955_vm1 = vmor %vm953_vm15, %vm954_vm14  ;;  %vm974_vm3 = vweird.f32 %v3928_v43 }
 0x23a   : > { %v949_v48 = vmul.f32 %v2867_v58, %v948_v51  ;;  %2870 = vrsqrt.f32 %v3935_v3  ;;  %vm4001_vm5 = vmor %vm973_vm2, %vm974_vm3  ;;  %vm963_vm6 = vweird.f32 %v3935_v3 }
 0x23b   : > { %v710_v10 = vsel %vm447_vm0, %v636_v46, 0.0  ;;  %v716_v53 = vsel %vm447_vm0, %v638_v62, 0.0  ;;  %v969_v52 = vmul.f32 %v3928_v43, %v968_v40 }
 0x23c   : > { %v950_v27 = vmul.f32 0.5, %v949_v48  ;;  %711 = vadd.xlane.f32.xlu0 %v710_v10  ;;  %v700_v15 = vpop.xlane.xlu1 %699  ;;  %717 = vadd.xlane.f32.xlu1 %v716_v53  ;;  %v534_v8 = vpop.xlane.xlu2 %533  ;;  %v2904_v10 = vld [vmem:[%s3288_s28] sm:$0xff] }
 0x23d   : > { %v760_v24 = vmul.f32 %v700_v15, %v3315_v20  ;;  %v516_v29 = vpop.xlane.xlu0 %515  ;;  %v579_v0 = vmul.f32 %v3315_v20, %v534_v8  ;;  %v970_v16 = vmul.f32 0.5, %v969_v52 }
 0x23e   : > { %v951_v28 = vsub.f32 1.5, %v950_v27  ;;  %v573_v33 = vmul.f32 %v3315_v20, %v516_v29 }
 0x23f   : > { %v3948_v50 = vadd.f32 1e-05, %v760_v24  ;;  %v3964_v57 = vsub.f32 %v3680_v23, %v579_v0  ;;  %v971_v51 = vsub.f32 1.5, %v970_v16 }
 0x240   : > { %v952_v5 = vmul.f32 %v2867_v58, %v951_v28  ;;  %v3955_v13 = vpop.eup %2870  ;;  %v3958_v39 = vsub.f32 %v3692_v34, %v573_v33 }
 0x241   : > { %v958_v59 = vmul.f32 %v3955_v13, %v3935_v3  ;;  %2872 = vrsqrt.f32 %v3948_v50  ;;  %v643_v24 = vmul.f32 %v3964_v57, %v3964_v57  ;;  %vm964_vm4 = vweird.f32 %v3955_v13 }
 0x242   : > { %v956_v19 = vsel %vm955_vm1, %v2867_v58, %v952_v5  ;;  %v637_v30 = vmul.f32 %v3958_v39, %v3958_v39  ;;  %v972_v0 = vmul.f32 %v3928_v43, %v971_v51  ;;  %vm965_vm7 = vmor %vm963_vm6, %vm964_vm4  ;;  %vm983_vm8 = vweird.f32 %v3948_v50 }
 0x243   : > { %v1609_v31 = vpop.f32.mrf.mxu1  ;;  %v1377_v32 = vpop.f32.mrf.mxu0  ;;  %v1141_v1 = vmul.f32 %v956_v19, %v3625_v36  ;;  %v959_v34 = vmul.f32 %v3955_v13, %v958_v59 }
 0x244   : > { %v1610_v58 = vadd.f32 %v3953_v54, %v1609_v31  ;;  %v1378_v7 = vadd.f32 %v3661_v2, %v1377_v32  ;;  %v522_v40 = vpop.xlane.xlu1 %521  ;;  %v713_v23 = vsel %vm447_vm0, %v637_v30, 0.0  ;;  %v537_v48 = vpop.xlane.xlu2 %536  ;;  %v731_v32 = vsel %vm447_vm0, %v643_v24, 0.0 }
 0x245   : > { %v1177_v46 = vmul.f32 %v3470_v6, %v1141_v1  ;;  %v960_v62 = vmul.f32 0.5, %v959_v34  ;;  %v575_v53 = vmul.f32 %v3315_v20, %v522_v40  ;;  %714 = vadd.xlane.f32.xlu0 %v713_v23  ;;  %v703_v52 = vpop.xlane.xlu0 %702  ;;  %v580_v28 = vmul.f32 %v3315_v20, %v537_v48  ;;  %v2905_v40 = vld [vmem:[%s3288_s28 + $0x8] sm:$0xff] }
 0x246   : > { %v1705_v36 = vadd.f32 %v2904_v10, %v1610_v58  ;;  %v1459_v27 = vmax.f32 %v1378_v7, 0.0  ;;  %v761_v15 = vmul.f32 %v703_v52, %v3315_v20 }
 0x247   : > { %v1213_v8 = vadd.f32 %v3481_v14, %v1177_v46  ;;  %v3983_v29 = vpop.eup %2872  ;;  %v961_v6 = vsub.f32 1.5, %v960_v62  ;;  %v3987_v33 = vsub.f32 %v3722_v9, %v575_v53  ;;  %v4010_v59 = vsub.f32 %v3725_v42, %v580_v28 }
 0x248   : > { %2666 = vmatmul.msk.f32.vlgmr.msra.gmra.mxu2 %vm447_vm0, %v1705_v36  ;;  %2641 = vmatmul.msk.f32.gmra.mxu1 %vm447_vm0, %v1459_v27  ;;  %v978_v14 = vmul.f32 %v3983_v29, %v3948_v50  ;;  %v3994_v5 = vadd.f32 1e-05, %v761_v15  ;;  %v976_v42 = vsel %vm4001_vm5, %v3928_v43, %v972_v0  ;;  %v4032_v27 = vld [vmem:[%s4688_s1] ss:$0 sm:$0xff]  ;;  %vm984_vm9 = vweird.f32 %v3983_v29 }
 0x249   : > { %2616 = vmatmul.msk.f32.gmra.mxu0 %vm447_vm0, %v1213_v8  ;;  %v962_v16 = vmul.f32 %v3955_v13, %v961_v6  ;;  %v639_v19 = vmul.f32 %v3987_v33, %v3987_v33  ;;  %v644_v62 = vmul.f32 %v4010_v59, %v4010_v59  ;;  %v1143_v8 = vmul.f32 %v976_v42, %v3628_v18  ;;  %v4050_v0 = vld [vmem:[%s4689_s2] ss:$0 sm:$0xff]  ;;  %vm4068_vm10 = vmor %vm983_vm8, %vm984_vm9 }
 0x24a   : > { %v979_v31 = vmul.f32 %v3983_v29, %v978_v14  ;;  %2874 = vrsqrt.f32 %v3994_v5  ;;  %vm993_vm11 = vweird.f32 %v3994_v5 }
 0x24b   : > { %v1612_v17 = vpop.f32.mrf.mxu1  ;;  %v966_v30 = vsel %vm965_vm7, %v3955_v13, %v962_v16  ;;  %v719_v3 = vsel %vm447_vm0, %v639_v19, 0.0  ;;  %v734_v16 = vsel %vm447_vm0, %v644_v62, 0.0  ;;  %v1179_v50 = vmul.f32 %v4032_v27, %v1143_v8  ;;  %v2910_v8 = vld [vmem:[%s3288_s28 + $0x20] sm:$0xff] }
 0x24c   : > { %v1613_v1 = vadd.f32 %v3953_v54, %v1612_v17  ;;  %v980_v34 = vmul.f32 0.5, %v979_v31  ;;  %v1380_v58 = vpop.f32.mrf.mxu0  ;;  %v525_v7 = vpop.xlane.xlu1 %524  ;;  %720 = vadd.xlane.f32.xlu2 %v719_v3  ;;  %v1142_v51 = vmul.f32 %v966_v30, %v3656_v49 }
 0x24d   : > { %v1381_v13 = vadd.f32 %v3661_v2, %v1380_v58  ;;  %v576_v46 = vmul.f32 %v3315_v20, %v525_v7  ;;  %732 = vadd.xlane.f32.xlu0 %v731_v32  ;;  %v706_v48 = vpop.xlane.xlu0 %705  ;;  %v540_v43 = vpop.xlane.xlu2 %539  ;;  %v2908_v58 = vld [vmem:[%s3288_s28 + $0x10] sm:$0xff] }
 0x24e   : > { %v1706_v23 = vadd.f32 %v2905_v40, %v1613_v1  ;;  %v981_v10 = vsub.f32 1.5, %v980_v34  ;;  %v762_v36 = vmul.f32 %v706_v48, %v3315_v20  ;;  %v1178_v49 = vmul.f32 %v4032_v27, %v1142_v51 }
 0x24f   : > { %v581_v53 = vmul.f32 %v3315_v20, %v540_v43  ;;  %v1460_v52 = vmax.f32 %v1381_v13, 0.0  ;;  %v4038_v15 = vsub.f32 %v3779_v47, %v576_v46 }
 0x250   : > { %2667 = vmatmul.msk.f32.gmra.mxu2 %vm447_vm0, %v1706_v23  ;;  %v4042_v28 = vpop.eup %2874  ;;  %v982_v24 = vmul.f32 %v3983_v29, %v981_v10  ;;  %v4045_v6 = vadd.f32 1e-05, %v762_v36  ;;  %v1214_v14 = vadd.f32 %v4050_v0, %v1178_v49  ;;  %v1215_v49 = vadd.f32 %v4050_v0, %v1179_v50 }
 0x251   : > { %v4054_v47 = vsub.f32 %v3785_v55, %v581_v53  ;;  %v988_v9 = vmul.f32 %v4042_v28, %v3994_v5  ;;  %2642 = vmatmul.msk.f32.gmra.mxu1 %vm447_vm0, %v1460_v52  ;;  %v640_v18 = vmul.f32 %v4038_v15, %v4038_v15  ;;  %vm994_vm12 = vweird.f32 %v4042_v28 }
 0x252   : > { %2876 = vrsqrt.f32 %v4045_v6  ;;  %2617 = vmatmul.msk.f32.gmra.mxu0 %vm447_vm0, %v1214_v14  ;;  %v986_v30 = vsel %vm4068_vm10, %v3983_v29, %v982_v24  ;;  %vm4102_vm13 = vmor %vm993_vm11, %vm994_vm12  ;;  %vm1003_vm14 = vweird.f32 %v4045_v6 }
 0x253   : > { %v1615_v19 = vpop.f32.mrf.mxu1  ;;  %v989_v31 = vmul.f32 %v4042_v28, %v988_v9  ;;  %v722_v32 = vsel %vm447_vm0, %v640_v18, 0.0  ;;  %v645_v42 = vmul.f32 %v4054_v47, %v4054_v47  ;;  %v1144_v53 = vmul.f32 %v986_v30, %v3689_v41  ;;  %v2909_v30 = vld [vmem:[%s3288_s28 + $0x18] sm:$0xff] }
 0x254   : > { %v1616_v17 = vadd.f32 %v3953_v54, %v1615_v19  ;;  %v1383_v1 = vpop.f32.mrf.mxu0  ;;  %v528_v3 = vpop.xlane.xlu1 %527  ;;  %723 = vadd.xlane.f32.xlu1 %v722_v32  ;;  %735 = vadd.xlane.f32.xlu2 %v734_v16 }
 0x255   : > { %v990_v34 = vmul.f32 0.5, %v989_v31  ;;  %v1384_v51 = vadd.f32 %v3661_v2, %v1383_v1  ;;  %v577_v40 = vmul.f32 %v3315_v20, %v528_v3  ;;  %v709_v23 = vpop.xlane.xlu0 %708  ;;  %v543_v13 = vpop.xlane.xlu2 %542  ;;  %v737_v24 = vsel %vm447_vm0, %v645_v42, 0.0 }
 0x256   : > { %v1707_v7 = vadd.f32 %v2908_v58, %v1616_v17  ;;  %v763_v29 = vmul.f32 %v709_v23, %v3315_v20  ;;  %v582_v46 = vmul.f32 %v3315_v20, %v543_v13  ;;  %v1180_v31 = vmul.f32 %v4032_v27, %v1144_v53 }
 0x257   : > { %v991_v48 = vsub.f32 1.5, %v990_v34  ;;  %v1461_v62 = vmax.f32 %v1384_v51, 0.0  ;;  %v4089_v43 = vsub.f32 %v3817_v45, %v577_v40 }
 0x258   : > { %2668 = vmatmul.msk.f32.gmra.mxu2 %vm447_vm0, %v1707_v7  ;;  %v4092_v10 = vpop.eup %2876  ;;  %v4094_v36 = vadd.f32 1e-05, %v763_v29  ;;  %v4098_v5 = vsub.f32 %v3822_v22, %v582_v46  ;;  %v1216_v7 = vadd.f32 %v4050_v0, %v1180_v31  ;;  %v2911_v31 = vld [vmem:[%s3288_s28 + $0x28] sm:$0xff] }
 0x259   : > { %v992_v52 = vmul.f32 %v4042_v28, %v991_v48  ;;  %v998_v45 = vmul.f32 %v4092_v10, %v4045_v6  ;;  %2643 = vmatmul.msk.f32.gmra.mxu1 %vm447_vm0, %v1461_v62  ;;  %v641_v22 = vmul.f32 %v4089_v43, %v4089_v43  ;;  %vm1004_vm15 = vweird.f32 %v4092_v10 }
 0x25a   : > { %2878 = vrsqrt.f32 %v4094_v36  ;;  %2618 = vmatmul.msk.f32.gmra.mxu0 %vm447_vm0, %v1215_v49  ;;  %v646_v17 = vmul.f32 %v4098_v5, %v4098_v5  ;;  %vm4140_vm1 = vmor %vm1003_vm14, %vm1004_vm15  ;;  %vm1013_vm2 = vweird.f32 %v4094_v36 }
 0x25b   : > { %v1618_v41 = vpop.f32.mrf.mxu1  ;;  %v999_v14 = vmul.f32 %v4092_v10, %v998_v45  ;;  %v725_v18 = vsel %vm447_vm0, %v641_v22, 0.0  ;;  %v996_v16 = vsel %vm4102_vm13, %v4042_v28, %v992_v52 }
 0x25c   : > { %v1619_v9 = vadd.f32 %v3953_v54, %v1618_v41  ;;  %v1386_v19 = vpop.f32.mrf.mxu0  ;;  %v531_v55 = vpop.xlane.xlu1 %530  ;;  %738 = vadd.xlane.f32.xlu1 %v737_v24  ;;  %726 = vadd.xlane.f32.xlu0 %v725_v18  ;;  %v1145_v51 = vmul.f32 %v996_v16, %v3748_v21 }
 0x25d   : > { %v1000_v32 = vmul.f32 0.5, %v999_v14  ;;  %v1387_v3 = vadd.f32 %v3661_v2, %v1386_v19  ;;  %v578_v50 = vmul.f32 %v3315_v20, %v531_v55 }
 0x25e   : > { %v1708_v1 = vadd.f32 %v2909_v30, %v1619_v9  ;;  %v1181_v49 = vmul.f32 %v4032_v27, %v1145_v51 }
 0x25f   : > { %v1001_v42 = vsub.f32 1.5, %v1000_v32  ;;  %v1462_v28 = vmax.f32 %v1387_v3, 0.0  ;;  %v4129_v34 = vsub.f32 %v3846_v60, %v578_v50  ;;  %v740_v60 = vsel %vm447_vm0, %v646_v17, 0.0 }
 0x260   : > { %2669 = vmatmul.msk.f32.gmra.mxu2 %vm447_vm0, %v1708_v1  ;;  %v2879_v58 = vpop.eup %2878  ;;  %v1217_v14 = vadd.f32 %v4050_v0, %v1181_v49 }
 0x261   : > { %v1002_v40 = vmul.f32 %v4092_v10, %v1001_v42  ;;  %v1008_v23 = vmul.f32 %v2879_v58, %v4094_v36  ;;  %2644 = vmatmul.msk.f32.gmra.mxu1 %vm447_vm0, %v1462_v28  ;;  %v642_v6 = vmul.f32 %v4129_v34, %v4129_v34  ;;  %vm1014_vm3 = vweird.f32 %v2879_v58 }
 0x262   : > { %2619 = vmatmul.msk.f32.gmra.mxu0 %vm447_vm0, %v1216_v7  ;;  %vm1015_vm4 = vmor %vm1013_vm2, %vm1014_vm3 }
 0x263   : > { %v1621_v29 = vpop.f32.mrf.mxu1  ;;  %v1009_v21 = vmul.f32 %v2879_v58, %v1008_v23  ;;  %v728_v48 = vsel %vm447_vm0, %v642_v6, 0.0  ;;  %v1006_v53 = vsel %vm4140_vm1, %v4092_v10, %v1002_v40 }
 0x264   : > { %v1622_v46 = vadd.f32 %v3953_v54, %v1621_v29  ;;  %v1389_v62 = vpop.f32.mrf.mxu0  ;;  %729 = vadd.xlane.f32.xlu2 %v728_v48  ;;  %741 = vadd.xlane.f32.xlu0 %v740_v60  ;;  %v1146_v9 = vmul.f32 %v1006_v53, %v3762_v38 }
 0x265   : > { %v1010_v52 = vmul.f32 0.5, %v1009_v21  ;;  %v1390_v24 = vadd.f32 %v3661_v2, %v1389_v62 }
 0x266   : > { %v1709_v45 = vadd.f32 %v2910_v8, %v1622_v46  ;;  %v1182_v36 = vmul.f32 %v4032_v27, %v1146_v9 }
 0x267   : > { %v1011_v22 = vsub.f32 1.5, %v1010_v52  ;;  %v1463_v41 = vmax.f32 %v1390_v24, 0.0 }
 0x268   : > { %2670 = vmatmul.msk.f32.gmra.mxu2 %vm447_vm0, %v1709_v45  ;;  %v1218_v38 = vadd.f32 %v4050_v0, %v1182_v36 }
 0x269   : > { %v1012_v18 = vmul.f32 %v2879_v58, %v1011_v22  ;;  %2645 = vmatmul.msk.f32.gmra.mxu1 %vm447_vm0, %v1463_v41 }
 0x26a   : > { %2620 = vmatmul.msk.f32.gmra.mxu0 %vm447_vm0, %v1217_v14 }
 0x26b   : > { %v1624_v10 = vpop.f32.mrf.mxu1  ;;  %v1016_v55 = vsel %vm1015_vm4, %v2879_v58, %v1012_v18  ;;  %v2912_v58 = vld [vmem:[%s3288_s28 + $0x30] sm:$0xff] }
 0x26c   : > { %v1625_v16 = vadd.f32 %v3953_v54, %v1624_v10  ;;  %v1392_v19 = vpop.f32.mrf.mxu0  ;;  %v1147_v1 = vmul.f32 %v1016_v55, %v3807_v12 }
 0x26d   : > { %v1393_v32 = vadd.f32 %v3661_v2, %v1392_v19 }
 0x26e   : > { %v1710_v17 = vadd.f32 %v2911_v31, %v1625_v16  ;;  %v1183_v28 = vmul.f32 %v4032_v27, %v1147_v1 }
 0x26f   : > { %v1464_v30 = vmax.f32 %v1393_v32, 0.0 }
 0x270   : > { %2671 = vmatmul.msk.f32.gmra.mxu2 %vm447_vm0, %v1710_v17  ;;  %v1219_v23 = vadd.f32 %v4050_v0, %v1183_v28 }
 0x271   : > { %2646 = vmatmul.msk.f32.gmra.mxu1 %vm447_vm0, %v1464_v30 }
 0x272   : > { %2621 = vmatmul.msk.f32.gmra.mxu0 %vm447_vm0, %v1218_v38 }
 0x273   : > { %v1627_v3 = vpop.f32.mrf.mxu1 }
 0x274   : > { %v1628_v50 = vadd.f32 %v3953_v54, %v1627_v3  ;;  %v1395_v42 = vpop.f32.mrf.mxu0 }
 0x275   : > { %v1396_v51 = vadd.f32 %v3661_v2, %v1395_v42 }
 0x276   : > { %v1711_v7 = vadd.f32 %v2912_v58, %v1628_v50 }
 0x277   : > { %v1465_v40 = vmax.f32 %v1396_v51, 0.0  ;;  %v2913_v51 = vld [vmem:[%s3288_s28 + $0x38] sm:$0xff] }
 0x278   : > { %2672 = vmatmul.msk.f32.gmra.mxu2 %vm447_vm0, %v1711_v7 }
 0x279   : > { %2647 = vmatmul.msk.f32.gmra.mxu1 %vm447_vm0, %v1465_v40 }
 0x27a   : > { %2622 = vmatmul.msk.f32.gmra.mxu0 %vm447_vm0, %v1219_v23 }
 0x2af   : > { %v712_v12 = vpop.xlane.xlu0 %711  ;;  %v718_v6 = vpop.xlane.xlu1 %717 }
 0x2b0   : > { %v764_v60 = vmul.f32 %v712_v12, %v3315_v20  ;;  %v766_v13 = vmul.f32 %v718_v6, %v3315_v20 }
 0x2b2   : > { %v796_v29 = vadd.f32 1e-05, %v764_v60  ;;  %v4178_v21 = vadd.f32 1e-05, %v766_v13 }
 0x2b4   : > { %2880 = vrsqrt.f32 %v796_v29  ;;  %vm1023_vm6 = vweird.f32 %v796_v29  ;;  %vm1043_vm8 = vweird.f32 %v4178_v21 }
 0x2b5   : > { %2882 = vrsqrt.f32 %v4178_v21 }
 0x2b8   : > { %v715_v46 = vpop.xlane.xlu0 %714 }
 0x2b9   : > { %v765_v62 = vmul.f32 %v715_v46, %v3315_v20 }
 0x2ba   : > { %v2881_v48 = vpop.eup %2880 }
 0x2bb   : > { %v4182_v49 = vpop.eup %2882  ;;  %v1018_v53 = vmul.f32 %v2881_v48, %v796_v29  ;;  %v797_v52 = vadd.f32 1e-05, %v765_v62  ;;  %vm1024_vm5 = vweird.f32 %v2881_v48 }
 0x2bc   : > { %v1038_v45 = vmul.f32 %v4182_v49, %v4178_v21  ;;  %vm1025_vm7 = vmor %vm1023_vm6, %vm1024_vm5  ;;  %vm1044_vm10 = vweird.f32 %v4182_v49  ;;  %v4236_v21 = vld [vmem:[%s4691_s4] ss:$0 sm:$0xff] }
 0x2bd   : > { %v1019_v8 = vmul.f32 %v2881_v48, %v1018_v53  ;;  %2884 = vrsqrt.f32 %v797_v52  ;;  %vm1033_vm11 = vweird.f32 %v797_v52  ;;  %vm4226_vm13 = vmor %vm1043_vm8, %vm1044_vm10 }
 0x2be   : > { %v1039_v18 = vmul.f32 %v4182_v49, %v1038_v45 }
 0x2bf   : > { %v1020_v24 = vmul.f32 0.5, %v1019_v8  ;;  %v721_v22 = vpop.xlane.xlu2 %720 }
 0x2c0   : > { %v767_v14 = vmul.f32 %v721_v22, %v3315_v20  ;;  %v733_v9 = vpop.xlane.xlu0 %732  ;;  %v1040_v30 = vmul.f32 0.5, %v1039_v18 }
 0x2c1   : > { %v1021_v41 = vsub.f32 1.5, %v1020_v24  ;;  %v771_v10 = vmul.f32 %v733_v9, %v3315_v20 }
 0x2c2   : > { %v4189_v19 = vadd.f32 1e-05, %v767_v14  ;;  %v1041_v6 = vsub.f32 1.5, %v1040_v30 }
 0x2c3   : > { %v1022_v16 = vmul.f32 %v2881_v48, %v1021_v41  ;;  %v2885_v36 = vpop.eup %2884  ;;  %v4191_v55 = vadd.f32 1e-05, %v771_v10 }
 0x2c4   : > { %v1028_v17 = vmul.f32 %v2885_v36, %v797_v52  ;;  %2886 = vrsqrt.f32 %v4189_v19  ;;  %vm1034_vm9 = vweird.f32 %v2885_v36  ;;  %v1042_v24 = vmul.f32 %v4182_v49, %v1041_v6 }
 0x2c5   : > { %v1026_v31 = vsel %vm1025_vm7, %v2881_v48, %v1022_v16  ;;  %v1630_v32 = vpop.f32.mrf.mxu1  ;;  %2888 = vrsqrt.f32 %v4191_v55  ;;  %vm1035_vm12 = vmor %vm1033_vm11, %vm1034_vm9  ;;  %vm1093_vm14 = vweird.f32 %v4191_v55  ;;  %vm1053_vm2 = vweird.f32 %v4189_v19 }
 0x2c6   : > { %v1398_v38 = vpop.f32.mrf.mxu0  ;;  %v1029_v1 = vmul.f32 %v2885_v36, %v1028_v17  ;;  %v1631_v3 = vadd.f32 %v3953_v54, %v1630_v32  ;;  %v1148_v42 = vmul.f32 %v1026_v31, %v3925_v4 }
 0x2c7   : > { %v1399_v50 = vadd.f32 %v3661_v2, %v1398_v38  ;;  %v724_v28 = vpop.xlane.xlu1 %723  ;;  %v736_v58 = vpop.xlane.xlu2 %735 }
 0x2c8   : > { %v1030_v7 = vmul.f32 0.5, %v1029_v1  ;;  %v1712_v40 = vadd.f32 %v2913_v51, %v1631_v3  ;;  %v768_v12 = vmul.f32 %v724_v28, %v3315_v20  ;;  %v772_v60 = vmul.f32 %v736_v58, %v3315_v20  ;;  %v2915_v3 = vld [vmem:[%s3288_s28 + $0x40] sm:$0xff] }
 0x2c9   : > { %v1466_v23 = vmax.f32 %v1399_v50, 0.0  ;;  %v1184_v13 = vmul.f32 %v4032_v27, %v1148_v42  ;;  %v1046_v1 = vsel %vm4226_vm13, %v4182_v49, %v1042_v24 }
 0x2ca   : > { %v4202_v29 = vpop.eup %2886  ;;  %v1031_v2 = vsub.f32 1.5, %v1030_v7  ;;  %v4205_v4 = vadd.f32 1e-05, %v768_v12  ;;  %2673 = vmatmul.msk.f32.gmra.mxu2 %vm447_vm0, %v1712_v40  ;;  %v4214_v62 = vadd.f32 1e-05, %v772_v60 }
 0x2cb   : > { %2648 = vmatmul.msk.f32.gmra.mxu1 %vm447_vm0, %v1466_v23  ;;  %v4209_v46 = vpop.eup %2888  ;;  %v1048_v48 = vmul.f32 %v4202_v29, %v4189_v19  ;;  %v1220_v53 = vadd.f32 %v4050_v0, %v1184_v13  ;;  %vm1054_vm3 = vweird.f32 %v4202_v29 }
 0x2cc   : > { %v1032_v8 = vmul.f32 %v2885_v36, %v1031_v2  ;;  %v1088_v45 = vmul.f32 %v4209_v46, %v4191_v55  ;;  %2890 = vrsqrt.f32 %v4205_v4  ;;  %vm1094_vm15 = vweird.f32 %v4209_v46  ;;  %vm4290_vm5 = vmor %vm1053_vm2, %vm1054_vm3 }
 0x2cd   : > { %v1049_v22 = vmul.f32 %v4202_v29, %v1048_v48  ;;  %2892 = vrsqrt.f32 %v4214_v62  ;;  %2623 = vmatmul.msk.f32.gmra.mxu0 %vm447_vm0, %v1220_v53  ;;  %vm1095_vm1 = vmor %vm1093_vm14, %vm1094_vm15  ;;  %v1150_v2 = vmul.f32 %v1046_v1, %v3931_v44  ;;  %vm1103_vm4 = vweird.f32 %v4214_v62 }
 0x2ce   : > { %v1036_v52 = vsel %vm1035_vm12, %v2885_v36, %v1032_v8  ;;  %v1089_v14 = vmul.f32 %v4209_v46, %v1088_v45  ;;  %v1633_v9 = vpop.f32.mrf.mxu1  ;;  %vm1063_vm7 = vweird.f32 %v4205_v4 }
 0x2cf   : > { %v1050_v18 = vmul.f32 0.5, %v1049_v22  ;;  %v1634_v10 = vadd.f32 %v3953_v54, %v1633_v9  ;;  %v1401_v16 = vpop.f32.mrf.mxu0  ;;  %v739_v31 = vpop.xlane.xlu1 %738  ;;  %v1149_v17 = vmul.f32 %v1036_v52, %v3958_v39 }
 0x2d0   : > { %v1090_v32 = vmul.f32 0.5, %v1089_v14  ;;  %v1402_v30 = vadd.f32 %v4236_v21, %v1401_v16  ;;  %v773_v36 = vmul.f32 %v739_v31, %v3315_v20  ;;  %v727_v38 = vpop.xlane.xlu0 %726 }
 0x2d1   : > { %v1713_v50 = vadd.f32 %v2915_v3, %v1634_v10  ;;  %v769_v39 = vmul.f32 %v727_v38, %v3315_v20  ;;  %v1051_v40 = vsub.f32 1.5, %v1050_v18  ;;  %v1185_v12 = vmul.f32 %v4032_v27, %v1149_v17  ;;  %v2916_v10 = vld [vmem:[%s3288_s28 + $0x48] sm:$0xff] }
 0x2d2   : > { %v4246_v42 = vpop.eup %2890  ;;  %v1091_v28 = vsub.f32 1.5, %v1090_v32  ;;  %v1467_v58 = vmax.f32 %v1402_v30, 0.0  ;;  %v4249_v7 = vadd.f32 1e-05, %v773_v36  ;;  %v1186_v17 = vmul.f32 %v4032_v27, %v1150_v2 }
 0x2d3   : > { %v4251_v51 = vpop.eup %2892  ;;  %v1058_v49 = vmul.f32 %v4246_v42, %v4205_v4  ;;  %v4255_v23 = vadd.f32 1e-05, %v769_v39  ;;  %2674 = vmatmul.msk.f32.gmra.mxu2 %vm447_vm0, %v1713_v50  ;;  %v1052_v45 = vmul.f32 %v4202_v29, %v1051_v40  ;;  %v1221_v55 = vadd.f32 %v4050_v0, %v1185_v12 }
 0x2d4   : > { %v1092_v6 = vmul.f32 %v4209_v46, %v1091_v28  ;;  %v1098_v60 = vmul.f32 %v4251_v51, %v4214_v62  ;;  %2894 = vrsqrt.f32 %v4249_v7  ;;  %2649 = vmatmul.msk.f32.gmra.mxu1 %vm447_vm0, %v1467_v58  ;;  %vm1104_vm6 = vweird.f32 %v4251_v51 }
 0x2d5   : > { %v1059_v13 = vmul.f32 %v4246_v42, %v1058_v49  ;;  %2896 = vrsqrt.f32 %v4255_v23  ;;  %2624 = vmatmul.msk.f32.gmra.mxu0 %vm447_vm0, %v1221_v55  ;;  %vm1105_vm8 = vmor %vm1103_vm4, %vm1104_vm6  ;;  %v1222_v40 = vadd.f32 %v4050_v0, %v1186_v17  ;;  %vm1064_vm9 = vweird.f32 %v4246_v42  ;;  %v2917_v55 = vld [vmem:[%s3288_s28 + $0x50] sm:$0xff] }
 0x2d6   : > { %v1096_v48 = vsel %vm1095_vm1, %v4209_v46, %v1092_v6  ;;  %v1099_v53 = vmul.f32 %v4251_v51, %v1098_v60  ;;  %v1636_v8 = vpop.f32.mrf.mxu1  ;;  %vm1113_vm10 = vweird.f32 %v4249_v7  ;;  %vm4343_vm12 = vmor %vm1063_vm7, %vm1064_vm9  ;;  %vm1073_vm14 = vweird.f32 %v4255_v23 }
 0x2d7   : > { %v1637_v24 = vadd.f32 %v3953_v54, %v1636_v8  ;;  %v1404_v22 = vpop.f32.mrf.mxu0  ;;  %v730_v41 = vpop.xlane.xlu2 %729  ;;  %v1155_v44 = vmul.f32 %v1096_v48, %v3964_v57  ;;  %v1060_v52 = vmul.f32 0.5, %v1059_v13  ;;  %vm2148_vm9 = vcmask 1047556  }
 0x2d8   : > { %v1100_v14 = vmul.f32 0.5, %v1099_v53  ;;  %v1405_v9 = vadd.f32 %v4236_v21, %v1404_v22  ;;  %v770_v46 = vmul.f32 %v730_v41, %v3315_v20  ;;  %v742_v18 = vpop.xlane.xlu0 %741 }
 0x2d9   : > { %v1714_v16 = vadd.f32 %v2916_v10, %v1637_v24  ;;  %v774_v31 = vmul.f32 %v742_v18, %v3315_v20  ;;  %v1056_v20 = vsel %vm4290_vm5, %v4202_v29, %v1052_v45  ;;  %v1191_v50 = vmul.f32 %v4032_v27, %v1155_v44 }
 0x2da   : > { %v4284_v32 = vpop.eup %2894  ;;  %v1101_v30 = vsub.f32 1.5, %v1100_v14  ;;  %v1468_v36 = vmax.f32 %v1405_v9, 0.0  ;;  %v4295_v38 = vadd.f32 1e-05, %v770_v46  ;;  %v1061_v39 = vsub.f32 1.5, %v1060_v52  ;;  %v2921_v52 = vld [vmem:[%s3288_s28 + $0x70] sm:$0xff] }
 0x2db   : > { %v4297_v1 = vpop.eup %2896  ;;  %v1108_v3 = vmul.f32 %v4284_v32, %v4249_v7  ;;  %v4304_v19 = vadd.f32 1e-05, %v774_v31  ;;  %2675 = vmatmul.msk.f32.gmra.mxu2 %vm447_vm0, %v1714_v16  ;;  %v1151_v49 = vmul.f32 %v1056_v20, %v3987_v33  ;;  %v1227_v62 = vadd.f32 %v4050_v0, %v1191_v50 }
 0x2dc   : > { %v1102_v28 = vmul.f32 %v4251_v51, %v1101_v30  ;;  %v1068_v58 = vmul.f32 %v4297_v1, %v4255_v23  ;;  %2898 = vrsqrt.f32 %v4295_v38  ;;  %2650 = vmatmul.msk.f32.gmra.mxu1 %vm447_vm0, %v1468_v36  ;;  %v1062_v8 = vmul.f32 %v4246_v42, %v1061_v39 }
 0x2dd   : > { %v1109_v29 = vmul.f32 %v4284_v32, %v1108_v3  ;;  %2900 = vrsqrt.f32 %v4304_v19  ;;  %vm1114_vm11 = vweird.f32 %v4284_v32  ;;  %2625 = vmatmul.msk.f32.gmra.mxu0 %vm447_vm0, %v1222_v40  ;;  %2630 = vmatmul.msk.f32.vlgmr.msra.gmra.mxu3 %vm447_vm0, %v1227_v62  ;;  %v1187_v46 = vmul.f32 %v4032_v27, %v1151_v49 }
 0x2de   : > { %v1106_v12 = vsel %vm1105_vm8, %v4251_v51, %v1102_v28  ;;  %v1069_v6 = vmul.f32 %v4297_v1, %v1068_v58  ;;  %v1639_v60 = vpop.f32.mrf.mxu1  ;;  %2736 = vmatpush.msra.mxu3 %v3872_v56  ;;  %v1066_v56 = vsel %vm4343_vm12, %v4246_v42, %v1062_v8  ;;  %vm1115_vm13 = vmor %vm1113_vm10, %vm1114_vm11  ;;  %vm1074_vm15 = vweird.f32 %v4297_v1 }
 0x2df   : > { %v1110_v13 = vmul.f32 0.5, %v1109_v29  ;;  %v1640_v2 = vadd.f32 %v3953_v54, %v1639_v60  ;;  %v1407_v48 = vpop.f32.mrf.mxu0  ;;  %v1156_v53 = vmul.f32 %v1106_v12, %v4010_v59  ;;  %v1152_v57 = vmul.f32 %v1066_v56, %v4038_v15  ;;  %vm1075_vm3 = vmor %vm1073_vm14, %vm1074_vm15 }
 0x2e0   : > { %v1070_v33 = vmul.f32 0.5, %v1069_v6  ;;  %v1408_v45 = vadd.f32 %v4236_v21, %v1407_v48  ;;  %2737 = vmatpush.msra.mxu3 %v3878_v35  ;;  %v1223_v35 = vadd.f32 %v4050_v0, %v1187_v46  ;;  %vm1123_vm1 = vweird.f32 %v4304_v19  ;;  %v1858_v46 = vpop.f32.mrf.mxu2 }
 0x2e1   : > { %v1111_v51 = vsub.f32 1.5, %v1110_v13  ;;  %v1715_v24 = vadd.f32 %v2917_v55, %v1640_v2  ;;  %v1192_v22 = vmul.f32 %v4032_v27, %v1156_v53  ;;  %vm1083_vm5 = vweird.f32 %v4295_v38  ;;  %v2920_v55 = vld [vmem:[%s3288_s28 + $0x68] sm:$0xff] }
 0x2e2   : > { %v4336_v41 = vpop.eup %2898  ;;  %v1469_v59 = vmax.f32 %v1408_v45, 0.0  ;;  %v1071_v4 = vsub.f32 1.5, %v1070_v33  ;;  %2738 = vmatpush.msra.mxu3 %v3884_v11  ;;  %v2918_v11 = vld [vmem:[%s3288_s28 + $0x58] sm:$0xff]  ;;  %vm1956_vm8 = vcmask 261120   ;;  %vm2432_vm10 = vcmask 31744  }
 0x2e3   : > { %v2901_v44 = vpop.eup %2900  ;;  %v1112_v14 = vmul.f32 %v4284_v32, %v1111_v51  ;;  %v1078_v9 = vmul.f32 %v4336_v41, %v4295_v38  ;;  %2676 = vmatmul.msk.f32.gmra.mxu2 %vm447_vm0, %v1715_v24  ;;  %v1228_v31 = vadd.f32 %v4050_v0, %v1192_v22  ;;  %vm1084_vm6 = vweird.f32 %v4336_v41 }
 0x2e4   : > { %v1118_v18 = vmul.f32 %v2901_v44, %v4304_v19  ;;  %2651 = vmatmul.msk.f32.gmra.mxu1 %vm447_vm0, %v1469_v59  ;;  %v1072_v36 = vmul.f32 %v4297_v1, %v1071_v4  ;;  %2739 = vmatpush.msra.mxu3 %v3890_v25  ;;  %vm1124_vm2 = vweird.f32 %v2901_v44  ;;  %v1188_v25 = vmul.f32 %v4032_v27, %v1152_v57  ;;  %vm1085_vm7 = vmor %vm1083_vm5, %vm1084_vm6 }
 0x2e5   : > { %v1116_v10 = vsel %vm1115_vm13, %v4284_v32, %v1112_v14  ;;  %v1079_v16 = vmul.f32 %v4336_v41, %v1078_v9  ;;  %2626 = vmatmul.msk.f32.gmra.mxu0 %vm447_vm0, %v1223_v35  ;;  %2631 = vmatmul.msk.f32.gmra.mxu3 %vm447_vm0, %v1228_v31  ;;  %vm1125_vm4 = vmor %vm1123_vm1, %vm1124_vm2  ;;  %v2923_v35 = vld [vmem:[%s3288_s28 + $0x80] sm:$0xff]  ;;  %vm2434_vm11 = vcmask 64512   ;;  %vm2436_vm12 = vcmask 97280  }
 0x2e6   : > { %v1119_v42 = vmul.f32 %v2901_v44, %v1118_v18  ;;  %v1642_v17 = vpop.f32.mrf.mxu1  ;;  %v1157_v7 = vmul.f32 %v1116_v10, %v4054_v47  ;;  %2740 = vmatpush.msra.mxu3 %v3896_v37  ;;  %v1076_v58 = vsel %vm1075_vm3, %v4297_v1, %v1072_v36  ;;  %v1224_v12 = vadd.f32 %v4050_v0, %v1188_v25  ;;  %v2922_v18 = vld [vmem:[%s3288_s28 + $0x78] sm:$0xff] }
 0x2e7   : > { %v1643_v32 = vadd.f32 %v3953_v54, %v1642_v17  ;;  %v1410_v30 = vpop.f32.mrf.mxu0  ;;  %v1080_v20 = vmul.f32 0.5, %v1079_v16  ;;  %v1153_v23 = vmul.f32 %v1076_v58, %v4089_v43  ;;  %vm2438_vm13 = vcmask 130048  }
 0x2e8   : > { %v1120_v3 = vmul.f32 0.5, %v1119_v42  ;;  %v1411_v50 = vadd.f32 %v4236_v21, %v1410_v30  ;;  %v1193_v47 = vmul.f32 %v4032_v27, %v1157_v7  ;;  %2741 = vmatpush.msra.mxu3 %v3902_v61  ;;  %v1861_v16 = vpop.f32.mrf.mxu2  ;;  %vm2440_vm14 = vcmask 162816  }
 0x2e9   : > { %v1716_v15 = vadd.f32 %v2918_v11, %v1643_v32  ;;  %v1081_v29 = vsub.f32 1.5, %v1080_v20  ;;  %v1189_v38 = vmul.f32 %v4032_v27, %v1153_v23  ;;  %vm2442_vm15 = vcmask 195584  }
 0x2ea   : > { %v1121_v39 = vsub.f32 1.5, %v1120_v3  ;;  %v1470_v28 = vmax.f32 %v1411_v50, 0.0  ;;  %v1229_v37 = vadd.f32 %v4050_v0, %v1193_v47  ;;  %2742 = vmatpush.msra.mxu3 %v3908_v26  ;;  %v2919_v26 = vld [vmem:[%s3288_s28 + $0x60] sm:$0xff]  ;;  %v2924_v47 = vld [vmem:[%s3288_s28 + $0x88] sm:$0xff]  ;;  %vm2444_vm1 = vcmask 228352  }
 0x2eb   : > { %2677 = vmatmul.msk.f32.gmra.mxu2 %vm447_vm0, %v1716_v15  ;;  %v1082_v13 = vmul.f32 %v4336_v41, %v1081_v29  ;;  %v1225_v8 = vadd.f32 %v4050_v0, %v1189_v38  ;;  %v2927_v38 = vld [vmem:[%s3288_s28 + $0x98] sm:$0xff]  ;;  %vm2447_vm2 = vcmask 293888   ;;  %vm2449_vm3 = vcmask 326656  }
 0x2ec   : > { %v1122_v40 = vmul.f32 %v2901_v44, %v1121_v39  ;;  %2652 = vmatmul.msk.f32.gmra.mxu1 %vm447_vm0, %v1470_v28  ;;  %2743 = vmatpush.msra.mxu3 %v3914_v63  ;;  %vm2453_vm5 = vcmask 392192   ;;  %vm2455_vm6 = vcmask 424960  }
 0x2ed   : > { %2627 = vmatmul.msk.f32.gmra.mxu0 %vm447_vm0, %v1224_v12  ;;  %2632 = vmatmul.msk.f32.gmra.mxu3 %vm447_vm0, %v1229_v37  ;;  %v1086_v2 = vsel %vm1085_vm7, %v4336_v41, %v1082_v13  ;;  %v2925_v12 = vld [vmem:[%s3288_s28 + $0x90] sm:$0xff]  ;;  %vm2457_vm7 = vcmask 457728  }
 0x2ee   : > { %v1126_v19 = vsel %vm1125_vm4, %v2901_v44, %v1122_v40  ;;  %v1645_v49 = vpop.f32.mrf.mxu1  ;;  %v1154_v53 = vmul.f32 %v1086_v2, %v4129_v34  ;;  %vm2451_vm4 = vcmask 359424  }
 0x2ef   : > { %v1646_v1 = vadd.f32 %v3953_v54, %v1645_v49  ;;  %v1413_v6 = vpop.f32.mrf.mxu0  ;;  %v1158_v60 = vmul.f32 %v1126_v19, %v4098_v5 }
 0x2f0   : > { %v1414_v61 = vadd.f32 %v4236_v21, %v1413_v6  ;;  %v1190_v41 = vmul.f32 %v4032_v27, %v1154_v53  ;;  %v1864_v36 = vpop.f32.mrf.mxu2 }
 0x2f1   : > { %v1717_v43 = vadd.f32 %v2919_v26, %v1646_v1  ;;  %v1194_v62 = vmul.f32 %v4032_v27, %v1158_v60 }
 0x2f2   : > { %v1471_v5 = vmax.f32 %v1414_v61, 0.0  ;;  %v1226_v34 = vadd.f32 %v4050_v0, %v1190_v41 }
 0x2f3   : > { %2678 = vmatmul.msk.f32.gmra.mxu2 %vm447_vm0, %v1717_v43  ;;  %v1230_v63 = vadd.f32 %v4050_v0, %v1194_v62  ;;  %v4453_v43 = vld [vmem:[%s4693_s6] ss:$0 sm:$0xff] }
 0x2f4   : > { %2653 = vmatmul.msk.f32.gmra.mxu1 %vm447_vm0, %v1471_v5 }
 0x2f5   : > { %2628 = vmatmul.msk.f32.gmra.mxu0 %vm447_vm0, %v1225_v8  ;;  %2633 = vmatmul.msk.f32.gmra.mxu3 %vm447_vm0, %v1230_v63 }
 0x2f6   : > { %v1648_v48 = vpop.f32.mrf.mxu1 }
 0x2f7   : > { %v1649_v33 = vadd.f32 %v3953_v54, %v1648_v48  ;;  %v1416_v45 = vpop.f32.mrf.mxu0 }
 0x2f8   : > { %v1417_v51 = vadd.f32 %v4236_v21, %v1416_v45  ;;  %v1867_v40 = vpop.f32.mrf.mxu2 }
 0x2f9   : > { %v1718_v24 = vadd.f32 %v2920_v55, %v1649_v33 }
 0x2fa   : > { %v1472_v22 = vmax.f32 %v1417_v51, 0.0 }
 0x2fb   : > { %2679 = vmatmul.msk.f32.gmra.mxu2 %vm447_vm0, %v1718_v24  ;;  %v2928_v24 = vld [vmem:[%s3288_s28 + $0xa0] sm:$0xff] }
 0x2fc   : > { %2654 = vmatmul.msk.f32.gmra.mxu1 %vm447_vm0, %v1472_v22 }
 0x2fd   : > { %2629 = vmatmul.msk.f32.gmra.mxu0 %vm447_vm0, %v1226_v34 }
 0x348   : > { %v1651_v59 = vpop.f32.mrf.mxu1 }
 0x349   : > { %v1652_v44 = vadd.f32 %v3953_v54, %v1651_v59 }
 0x34a   : > { %v1419_v9 = vpop.f32.mrf.mxu0 }
 0x34b   : > { %v1719_v14 = vadd.f32 %v2921_v52, %v1652_v44  ;;  %v1420_v56 = vadd.f32 %v4236_v21, %v1419_v9 }
 0x34d   : > { %2680 = vmatmul.msk.f32.gmra.mxu2 %vm447_vm0, %v1719_v14  ;;  %v1473_v27 = vmax.f32 %v1420_v56, 0.0  ;;  %v1870_v14 = vpop.f32.mrf.mxu2 }
 0x34f   : > { %2655 = vmatmul.msk.f32.gmra.mxu1 %vm447_vm0, %v1473_v27 }
 0x351   : > { %v1654_v4 = vpop.f32.mrf.mxu1 }
 0x352   : > { %v1655_v0 = vadd.f32 %v3953_v54, %v1654_v4  ;;  %v1422_v31 = vpop.f32.mrf.mxu0 }
 0x353   : > { %v1423_v42 = vadd.f32 %v4236_v21, %v1422_v31 }
 0x354   : > { %v1720_v10 = vadd.f32 %v2922_v18, %v1655_v0 }
 0x355   : > { %v1474_v17 = vmax.f32 %v1423_v42, 0.0  ;;  %v1873_v9 = vpop.f32.mrf.mxu2 }
 0x356   : > { %2681 = vmatmul.msk.f32.gmra.mxu2 %vm447_vm0, %v1720_v10  ;;  %v2929_v10 = vld [vmem:[%s3288_s28 + $0xa8] sm:$0xff] }
 0x357   : > { %2656 = vmatmul.msk.f32.gmra.mxu1 %vm447_vm0, %v1474_v17  ;;  %v2930_v17 = vld [vmem:[%s3288_s28 + $0xb0] sm:$0xff] }
 0x359   : > { %v1657_v7 = vpop.f32.mrf.mxu1 }
 0x35a   : > { %v1658_v57 = vadd.f32 %v3953_v54, %v1657_v7  ;;  %v1425_v30 = vpop.f32.mrf.mxu0 }
 0x35b   : > { %v1426_v20 = vadd.f32 %v4236_v21, %v1425_v30  ;;  %v2931_v30 = vld [vmem:[%s3288_s28 + $0xb8] sm:$0xff] }
 0x35c   : > { %v1721_v32 = vadd.f32 %v2923_v35, %v1658_v57 }
 0x35d   : > { %v1475_v3 = vmax.f32 %v1426_v20, 0.0 }
 0x35e   : > { %2682 = vmatmul.msk.f32.gmra.mxu2 %vm447_vm0, %v1721_v32 }
 0x35f   : > { %2657 = vmatmul.msk.f32.gmra.mxu1 %vm447_vm0, %v1475_v3 }
 0x360   : > { %v1440_v15 = vpop.f32.mrf.mxu3 }
 0x361   : > { %v1660_v50 = vpop.f32.mrf.mxu1  ;;  %v1441_v28 = vadd.f32 %v4236_v21, %v1440_v15 }
 0x362   : > { %v1661_v11 = vadd.f32 %v3953_v54, %v1660_v50  ;;  %v1428_v25 = vpop.f32.mrf.mxu0  ;;  %v2932_v50 = vld [vmem:[%s3288_s28 + $0xc0] sm:$0xff] }
 0x363   : > { %v1480_v58 = vmax.f32 %v1441_v28, 0.0  ;;  %v1429_v29 = vadd.f32 %v4236_v21, %v1428_v25  ;;  %v2933_v28 = vld [vmem:[%s3288_s28 + $0xe0] sm:$0xff] }
 0x364   : > { %v1722_v39 = vadd.f32 %v2924_v47, %v1661_v11 }
 0x365   : > { %v1476_v37 = vmax.f32 %v1429_v29, 0.0  ;;  %2662 = vmatmul.msk.f32.vlgmr.msrb.gmra.mxu3 %vm447_vm0, %v1480_v58 }
 0x366   : > { %2683 = vmatmul.msk.f32.gmra.mxu2 %vm447_vm0, %v1722_v39  ;;  %1975 = vmatpush.msrb.mxu3 %v1867_v40  ;;  %v2934_v40 = vld [vmem:[%s3288_s28 + $0xc8] sm:$0xff] }
 0x367   : > { %2658 = vmatmul.msk.f32.gmra.mxu1 %vm447_vm0, %v1476_v37 }
 0x368   : > { %1976 = vmatpush.msrb.mxu3 %v1864_v36  ;;  %v1443_v23 = vpop.f32.mrf.mxu3 }
 0x369   : > { %v1663_v19 = vpop.f32.mrf.mxu1  ;;  %v1444_v6 = vadd.f32 %v4236_v21, %v1443_v23 }
 0x36a   : > { %v1664_v49 = vadd.f32 %v3953_v54, %v1663_v19  ;;  %1977 = vmatpush.msrb.mxu3 %v1861_v16  ;;  %v1431_v60 = vpop.f32.mrf.mxu0 }
 0x36b   : > { %v1481_v13 = vmax.f32 %v1444_v6, 0.0  ;;  %v1432_v61 = vadd.f32 %v4236_v21, %v1431_v60 }
 0x36c   : > { %v1723_v1 = vadd.f32 %v2925_v12, %v1664_v49  ;;  %1978 = vmatpush.msrb.mxu3 %v1858_v46  ;;  %v1876_v46 = vpop.f32.mrf.mxu2  ;;  %v2935_v12 = vld [vmem:[%s3288_s28 + $0xe8] sm:$0xff] }
 0x36d   : > { %v1477_v26 = vmax.f32 %v1432_v61, 0.0  ;;  %2663 = vmatmul.msk.f32.gmra.mxu3 %vm447_vm0, %v1481_v13  ;;  %v2936_v13 = vld [vmem:[%s3288_s28 + $0xd0] sm:$0xff] }
 0x36e   : > { %2684 = vmatmul.msk.f32.gmra.mxu2 %vm447_vm0, %v1723_v1 }
 0x36f   : > { %2659 = vmatmul.msk.f32.gmra.mxu1 %vm447_vm0, %v1477_v26 }
 0x370   : > { %v1446_v5 = vpop.f32.mrf.mxu3 }
 0x371   : > { %v1666_v54 = vpop.f32.mrf.mxu1  ;;  %v1447_v63 = vadd.f32 %v4236_v21, %v1446_v5  ;;  %v2937_v5 = vld [vmem:[%s3288_s28 + $0xf0] sm:$0xff] }
 0x372   : > { %v1667_v62 = vadd.f32 %v4453_v43, %v1666_v54  ;;  %v1434_v48 = vpop.f32.mrf.mxu0 }
 0x373   : > { %v1482_v53 = vmax.f32 %v1447_v63, 0.0  ;;  %v1435_v8 = vadd.f32 %v4236_v21, %v1434_v48  ;;  %v2938_v48 = vld [vmem:[%s3288_s28 + $0xd8] sm:$0xff] }
 0x374   : > { %v1724_v2 = vadd.f32 %v2927_v38, %v1667_v62  ;;  %v1879_v56 = vpop.f32.mrf.mxu2 }
 0x375   : > { %v1478_v33 = vmax.f32 %v1435_v8, 0.0  ;;  %2664 = vmatmul.msk.f32.gmra.mxu3 %vm447_vm0, %v1482_v53 }
 0x376   : > { %2685 = vmatmul.msk.f32.gmra.mxu2 %vm447_vm0, %v1724_v2 }
 0x377   : > { %2660 = vmatmul.msk.f32.gmra.mxu1 %vm447_vm0, %v1478_v33 }
 0x378   : > { %v1449_v55 = vpop.f32.mrf.mxu3 }
 0x379   : > { %v1669_v45 = vpop.f32.mrf.mxu1  ;;  %v1450_v41 = vadd.f32 %v4236_v21, %v1449_v55 }
 0x37a   : > { %v1670_v51 = vadd.f32 %v4453_v43, %v1669_v45  ;;  %v1437_v34 = vpop.f32.mrf.mxu0  ;;  %v2939_v45 = vld [vmem:[%s3288_s28 + $0xf8] sm:$0xff]  ;;  %s3109_s28 = smov 28  }
 0x37b   : > { %v1483_v59 = vmax.f32 %v1450_v41, 0.0  ;;  %v1438_v44 = vadd.f32 %v4236_v21, %v1437_v34  ;;  %v1955_v41 = vld [vmem:[#allocation7 + $0x8] sm:$0xff] }
 0x37c   : > { %v1725_v22 = vadd.f32 %v2928_v24, %v1670_v51  ;;  %v4470_v27 = vpop.f32.mrf.mxu2  ;;  %v1954_v24 = vld [vmem:[#allocation7] sm:$0xff] }
 0x37d   : > { %v1479_v52 = vmax.f32 %v1438_v44, 0.0  ;;  %2665 = vmatmul.msk.f32.gmra.mxu3 %vm447_vm0, %v1483_v59 }
 0x37e   : > { %2686 = vmatmul.msk.f32.gmra.mxu2 %vm447_vm0, %v1725_v22 }
 0x37f   : > { %2661 = vmatmul.msk.f32.gmra.mxu1 %vm447_vm0, %v1479_v52 }
 0x384   : > { %v4473_v18 = vpop.f32.mrf.mxu2 }
 0x38c   : > { %v4477_v31 = vpop.f32.mrf.mxu2 }
 0x394   : > { %v1891_v32 = vpop.f32.mrf.mxu2 }
 0x39c   : > { %v1894_v47 = vpop.f32.mrf.mxu2 }
 0x3a4   : > { %v1897_v23 = vpop.f32.mrf.mxu2 }
 0x3cc   : > { %v1672_v4 = vpop.f32.mrf.mxu1 }
 0x3cd   : > { %v1673_v0 = vadd.f32 %v4453_v43, %v1672_v4 }
 0x3cf   : > { %v1726_v21 = vadd.f32 %v2929_v10, %v1673_v0 }
 0x3d0   : > { %v1900_v62 = vpop.f32.mrf.mxu2 }
 0x3d1   : > { %2687 = vmatmul.msk.f32.gmra.mxu2 %vm447_vm0, %v1726_v21 }
 0x3d4   : > { %v1675_v16 = vpop.f32.mrf.mxu1 }
 0x3d5   : > { %v1676_v42 = vadd.f32 %v4453_v43, %v1675_v16 }
 0x3d7   : > { %v1727_v7 = vadd.f32 %v2930_v17, %v1676_v42 }
 0x3d9   : > { %2688 = vmatmul.msk.f32.gmra.mxu2 %vm447_vm0, %v1727_v7  ;;  %v1903_v55 = vpop.f32.mrf.mxu2 }
 0x3dc   : > { %v1678_v57 = vpop.f32.mrf.mxu1 }
 0x3dd   : > { %v1679_v35 = vadd.f32 %v4453_v43, %v1678_v57 }
 0x3df   : > { %v1728_v36 = vadd.f32 %v2931_v30, %v1679_v35 }
 0x3e1   : > { %2689 = vmatmul.msk.f32.gmra.mxu2 %vm447_vm0, %v1728_v36  ;;  %v1906_v22 = vpop.f32.mrf.mxu2 }
 0x3e4   : > { %v1681_v20 = vpop.f32.mrf.mxu1 }
 0x3e5   : > { %v1682_v3 = vadd.f32 %v4453_v43, %v1681_v20  ;;  %v3107_v20 = vmov 1983009808  }
 0x3e7   : > { %v1729_v11 = vadd.f32 %v2932_v50, %v1682_v3  ;;  %v2153_v3 = vunpack.c.l.s4 %v3107_v20 }
 0x3e8   : > { %v1693_v15 = vpop.f32.mrf.mxu3 }
 0x3e9   : > { %v1694_v39 = vadd.f32 %v4453_v43, %v1693_v15  ;;  %2690 = vmatmul.msk.f32.gmra.mxu2 %vm447_vm0, %v1729_v11 }
 0x3eb   : > { %v1733_v25 = vadd.f32 %v2933_v28, %v1694_v39 }
 0x3ec   : > { %v1684_v58 = vpop.f32.mrf.mxu1 }
 0x3ed   : > { %v1685_v29 = vadd.f32 %v4453_v43, %v1684_v58  ;;  %2694 = vmatmul.msk.f32.vlgmr.msra.gmra.mxu3 %vm447_vm0, %v1733_v25 }
 0x3ee   : > { %1998 = vmatpush.msra.mxu3 %v1879_v56 }
 0x3ef   : > { %v1730_v37 = vadd.f32 %v2934_v40, %v1685_v29 }
 0x3f0   : > { %1999 = vmatpush.msra.mxu3 %v1876_v46  ;;  %v1696_v19 = vpop.f32.mrf.mxu3 }
 0x3f1   : > { %v1697_v49 = vadd.f32 %v4453_v43, %v1696_v19  ;;  %2691 = vmatmul.msk.f32.gmra.mxu2 %vm447_vm0, %v1730_v37 }
 0x3f2   : > { %2000 = vmatpush.msra.mxu3 %v1873_v9 }
 0x3f3   : > { %v1734_v1 = vadd.f32 %v2935_v12, %v1697_v49 }
 0x3f4   : > { %2001 = vmatpush.msra.mxu3 %v1870_v14  ;;  %v1687_v6 = vpop.f32.mrf.mxu1 }
 0x3f5   : > { %v1688_v60 = vadd.f32 %v4453_v43, %v1687_v6  ;;  %2695 = vmatmul.msk.f32.gmra.mxu3 %vm447_vm0, %v1734_v1 }
 0x3f7   : > { %v1731_v61 = vadd.f32 %v2936_v13, %v1688_v60 }
 0x3f8   : > { %v1699_v26 = vpop.f32.mrf.mxu3 }
 0x3f9   : > { %v1700_v54 = vadd.f32 %v4453_v43, %v1699_v26  ;;  %2692 = vmatmul.msk.f32.gmra.mxu2 %vm447_vm0, %v1731_v61 }
 0x3fb   : > { %v1735_v38 = vadd.f32 %v2937_v5, %v1700_v54 }
 0x3fc   : > { %v1690_v2 = vpop.f32.mrf.mxu1 }
 0x3fd   : > { %v1691_v63 = vadd.f32 %v4453_v43, %v1690_v2  ;;  %2696 = vmatmul.msk.f32.gmra.mxu3 %vm447_vm0, %v1735_v38 }
 0x3ff   : > { %v1732_v53 = vadd.f32 %v2938_v48, %v1691_v63 }
 0x400   : > { %v1702_v8 = vpop.f32.mrf.mxu3 }
 0x401   : > { %v1703_v33 = vadd.f32 %v4453_v43, %v1702_v8  ;;  %2693 = vmatmul.msk.f32.gmra.mxu2 %vm447_vm0, %v1732_v53  ;;  %v1909_v43 = vpop.f32.mrf.mxu2 }
 0x403   : > { %v1736_v51 = vadd.f32 %v2939_v45, %v1703_v33 }
 0x405   : > { %2697 = vmatmul.msk.f32.gmra.mxu3 %vm447_vm0, %v1736_v51 }
 0x409   : > { %v1912_v34 = vpop.f32.mrf.mxu2 }
 0x40d   : > { %2698 = vmatmul.msk.f32.vlgmr.msrb.gmra.mxu3 %vm1956_vm8, %v1954_v24 }
 0x40e   : > { %2021 = vmatpush.msrb.mxu3 %v1891_v32 }
 0x410   : > { %2022 = vmatpush.msrb.mxu3 %v4477_v31 }
 0x411   : > { %v1915_v59 = vpop.f32.mrf.mxu2 }
 0x412   : > { %2023 = vmatpush.msrb.mxu3 %v4473_v18 }
 0x414   : > { %2024 = vmatpush.msrb.mxu3 %v4470_v27 }
 0x415   : > { %2699 = vmatmul.msk.f32.gmra.mxu3 %vm1956_vm8, %v1955_v41 }
 0x419   : > { %v1918_v44 = vpop.f32.mrf.mxu2 }
 0x41d   : > { %2700 = vmatmul.msk.f32.vlgmr.msra.gmra.mxu3 %vm1956_vm8, %v1954_v24 }
 0x41e   : > { %2044 = vmatpush.msra.mxu3 %v1903_v55 }
 0x420   : > { %2045 = vmatpush.msra.mxu3 %v1900_v62 }
 0x422   : > { %2046 = vmatpush.msra.mxu3 %v1897_v23 }
 0x424   : > { %2047 = vmatpush.msra.mxu3 %v1894_v47  ;;  %v4531_v47 = vunpack.c.0.s8 %v2153_v3 }
 0x425   : > { %2701 = vmatmul.msk.f32.gmra.mxu3 %vm1956_vm8, %v1955_v41 }
 0x42d   : > { %2702 = vmatmul.msk.f32.vlgmr.msrb.gmra.mxu3 %vm1956_vm8, %v1954_v24 }
 0x42e   : > { %2067 = vmatpush.msrb.mxu3 %v1915_v59 }
 0x430   : > { %2068 = vmatpush.msrb.mxu3 %v1912_v34 }
 0x432   : > { %2069 = vmatpush.msrb.mxu3 %v1909_v43 }
 0x434   : > { %2070 = vmatpush.msrb.mxu3 %v1906_v22 }
 0x435   : > { %2703 = vmatmul.msk.f32.gmra.mxu3 %vm1956_vm8, %v1955_v41 }
 0x43d   : > { %2704 = vmatmul.msk.f32.vlgmr.msra.gmra.mxu3 %vm1956_vm8, %v1954_v24 }
 0x445   : > { %2705 = vmatmul.msk.f32.gmra.mxu3 %vm1956_vm8, %v1955_v41 }
 0x44d   : > { %2706 = vmatmul.msk.f32.vlgmr.msrb.gmra.mxu3 %vm1956_vm8, %v1954_v24 }
 0x454   : > { %v1921_v52 = vpop.f32.mrf.mxu2 }
 0x455   : > { %2707 = vmatmul.msk.f32.gmra.mxu3 %vm1956_vm8, %v1955_v41 }
 0x45c   : > { %v1924_v14 = vpop.f32.mrf.mxu2 }
 0x464   : > { %v1927_v9 = vpop.f32.mrf.mxu2 }
 0x465   : > { %2090 = vmatpush.msra.mxu3 %v1927_v9 }
 0x467   : > { %2091 = vmatpush.msra.mxu3 %v1924_v14 }
 0x469   : > { %2092 = vmatpush.msra.mxu3 %v1921_v52 }
 0x46b   : > { %2093 = vmatpush.msra.mxu3 %v1918_v44 }
 0x46c   : > { %v1930_v46 = vpop.f32.mrf.mxu2  ;;  %2708 = vmatmul.msk.f32.vlgmr.msra.gmra.mxu3 %vm1956_vm8, %v1954_v24 }
 0x470   : > { %v1942_v56 = vpop.f32.mrf.mxu3 }
 0x474   : > { %v1933_v27 = vpop.f32.mrf.mxu2  ;;  %2709 = vmatmul.msk.f32.gmra.mxu3 %vm1956_vm8, %v1955_v41 }
 0x478   : > { %v1945_v4 = vpop.f32.mrf.mxu3 }
 0x47c   : > { %v1936_v0 = vpop.f32.mrf.mxu2 }
 0x480   : > { %v1948_v18 = vpop.f32.mrf.mxu3 }
 0x484   : > { %v1939_v10 = vpop.f32.mrf.mxu2 }
 0x485   : > { %2113 = vmatpush.msrb.mxu3 %v1939_v10 }
 0x487   : > { %2114 = vmatpush.msrb.mxu3 %v1936_v0 }
 0x488   : > { %v1951_v21 = vpop.f32.mrf.mxu3 }
 0x489   : > { %2115 = vmatpush.msrb.mxu3 %v1933_v27 }
 0x48b   : > { %2116 = vmatpush.msrb.mxu3 %v1930_v46 }
 0x48c   : > { %2710 = vmatmul.msk.f32.vlgmr.msrb.gmra.mxu3 %vm1956_vm8, %v1954_v24 }
 0x48d   : > { %2136 = vmatpush.msra.mxu3 %v1951_v21 }
 0x48f   : > { %2137 = vmatpush.msra.mxu3 %v1948_v18 }
 0x490   : > { %v1980_v16 = vpop.f32.mrf.mxu3 }
 0x491   : > { %2138 = vmatpush.msra.mxu3 %v1945_v4  ;;  %v2150_v7 = vrot.slane %v1980_v16, 4  ;;  %v3108_v4 = vmov 1934713408  }
 0x492   : > { %v2201_v0 = vunpack.c.l.s4 %v3108_v4 }
 0x493   : > { %2139 = vmatpush.msra.mxu3 %v1942_v56 }
 0x494   : > { %2711 = vmatmul.msk.f32.gmra.mxu3 %vm1956_vm8, %v1955_v41  ;;  %v4570_v21 = vunpack.c.0.s8 %v2201_v0 }
 0x498   : > { %v1983_v31 = vpop.f32.mrf.mxu3 }
 0x499   : > { %v2262_v36 = vrot.slane %v1983_v31, 4 }
 0x49c   : > { %2712 = vmatmul.msk.f32.vlgmr.msra.gmra.mxu3 %vm1956_vm8, %v1954_v24 }
 0x4a0   : > { %v2003_v42 = vpop.f32.mrf.mxu3 }
 0x4a1   : > { %v2162_v28 = vrot.slane %v2003_v42, 4 }
 0x4a4   : > { %2713 = vmatmul.msk.f32.gmra.mxu3 %vm1956_vm8, %v1955_v41 }
 0x4a8   : > { %v2006_v17 = vpop.f32.mrf.mxu3 }
 0x4a9   : > { %v2274_v13 = vrot.slane %v2006_v17, 4 }
 0x4b0   : > { %v2026_v57 = vpop.f32.mrf.mxu3 }
 0x4b1   : > { %v2147_v35 = vrot.slane %v2026_v57, 4  ;;  %v2151_v32 = vsel %vm2148_vm9, %v2026_v57, %v2150_v7 }
 0x4b2   : > { %v2159_v25 = vperm.slane %v2151_v32, %v4531_v47 }
 0x4b3   : > { %v2149_v30 = vsel %vm2148_vm9, %v2147_v35, %v1980_v16 }
 0x4b4   : > { %v2155_v58 = vperm.slane %v2149_v30, %v4531_v47  ;;  %v2210_v19 = vrot.slane %v2159_v25, 4 }
 0x4b6   : > { %v2198_v12 = vrot.slane %v2155_v58, 4 }
 0x4b8   : > { %v2029_v50 = vpop.f32.mrf.mxu3 }
 0x4b9   : > { %v2260_v11 = vrot.slane %v2029_v50, 4  ;;  %v2263_v15 = vsel %vm2148_vm9, %v2029_v50, %v2262_v36 }
 0x4ba   : > { %v2271_v61 = vperm.slane %v2263_v15, %v4531_v47 }
 0x4bb   : > { %v2261_v39 = vsel %vm2148_vm9, %v2260_v11, %v1983_v31 }
 0x4bc   : > { %v2267_v5 = vperm.slane %v2261_v39, %v4531_v47  ;;  %v2322_v53 = vrot.slane %v2271_v61, 4 }
 0x4be   : > { %v2310_v45 = vrot.slane %v2267_v5, 4 }
 0x4c0   : > { %v2049_v29 = vpop.f32.mrf.mxu3 }
 0x4c1   : > { %v2160_v40 = vrot.slane %v2049_v29, 4  ;;  %v2163_v37 = vsel %vm2148_vm9, %v2049_v29, %v2162_v28 }
 0x4c2   : > { %v2171_v49 = vperm.slane %v2163_v37, %v4531_v47 }
 0x4c3   : > { %v2161_v23 = vsel %vm2148_vm9, %v2160_v40, %v2003_v42 }
 0x4c4   : > { %v2167_v1 = vperm.slane %v2161_v23, %v4531_v47  ;;  %v2208_v6 = vrot.slane %v2171_v49, 4  ;;  %v2211_v60 = vsel %vm2148_vm9, %v2171_v49, %v2210_v19 }
 0x4c5   : > { %v2219_v35 = vperm.slane %v2211_v60, %v4570_v21 }
 0x4c6   : > { %v2196_v26 = vrot.slane %v2167_v1, 4  ;;  %v2209_v54 = vsel %vm2148_vm9, %v2208_v6, %v2159_v25  ;;  %v2199_v62 = vsel %vm2148_vm9, %v2167_v1, %v2198_v12 }
 0x4c7   : > { %v4578_v36 = vperm.slane %v2209_v54, %v4570_v21  ;;  %v2207_v3 = vperm.slane %v2199_v62, %v4570_v21 }
 0x4c8   : > { %v2052_v38 = vpop.f32.mrf.mxu3  ;;  %v4546_v2 = vsel %vm2148_vm9, %v2196_v26, %v2155_v58  ;;  %v2258_v58 = vrot.slane %v2219_v35, 4 }
 0x4c9   : > { %v2272_v63 = vrot.slane %v2052_v38, 4  ;;  %v2275_v48 = vsel %vm2148_vm9, %v2052_v38, %v2274_v13  ;;  %v2254_v37 = vrot.slane %v4578_v36, 4  ;;  %v2250_v1 = vrot.slane %v2207_v3, 4 }
 0x4ca   : > { %v2283_v8 = vperm.slane %v2275_v48, %v4531_v47  ;;  %v4601_v48 = vperm.slane %v4546_v2, %v4570_v21 }
 0x4cb   : > { %v2273_v33 = vsel %vm2148_vm9, %v2272_v63, %v2006_v17 }
 0x4cc   : > { %v2279_v51 = vperm.slane %v2273_v33, %v4531_v47  ;;  %v2320_v55 = vrot.slane %v2283_v8, 4  ;;  %v4553_v24 = vsel %vm2148_vm9, %v2283_v8, %v2322_v53 }
 0x4ce   : > { %v2308_v22 = vrot.slane %v2279_v51, 4  ;;  %v4556_v41 = vsel %vm2148_vm9, %v2279_v51, %v2310_v45  ;;  %v4559_v43 = vsel %vm2148_vm9, %v2320_v55, %v2271_v61 }
 0x4d0   : > { %v4562_v34 = vsel %vm2148_vm9, %v2308_v22, %v2267_v5  ;;  %v2072_v59 = vpop.f32.mrf.mxu3 }
 0x4d1   : > { %v2174_v56 = vrot.slane %v2072_v59, 4 }
 0x4d8   : > { %v4564_v44 = vpop.f32.mrf.mxu3 }
 0x4d9   : > { %v2286_v22 = vrot.slane %v4564_v44, 4 }
 0x4ef   : > { %v2095_v52 = vpop.f32.mrf.mxu3 }
 0x4f0   : > { %v2186_v31 = vrot.slane %v2095_v52, 4 }
 0x4f7   : > { %v2098_v14 = vpop.f32.mrf.mxu3 }
 0x4f8   : > { %v2298_v6 = vrot.slane %v2098_v14, 4 }
 0x50f   : > { %v2118_v9 = vpop.f32.mrf.mxu3 }
 0x510   : > { %v2172_v27 = vrot.slane %v2118_v9, 4  ;;  %v2175_v18 = vsel %vm2148_vm9, %v2118_v9, %v2174_v56 }
 0x511   : > { %v2183_v16 = vperm.slane %v2175_v18, %v4531_v47  ;;  %v2319_v18 = vperm.slane %v4556_v41, %v4570_v21 }
 0x512   : > { %v2173_v10 = vsel %vm2148_vm9, %v2172_v27, %v2072_v59 }
 0x513   : > { %v2179_v42 = vperm.slane %v2173_v10, %v4531_v47  ;;  %v2234_v32 = vrot.slane %v2183_v16, 4 }
 0x515   : > { %v2222_v50 = vrot.slane %v2179_v42, 4 }
 0x517   : > { %v4566_v46 = vpop.f32.mrf.mxu3 }
 0x518   : > { %v2284_v28 = vrot.slane %v4566_v46, 4  ;;  %v2287_v2 = vsel %vm2148_vm9, %v4566_v46, %v2286_v22  ;;  %v2315_v46 = vperm.slane %v4562_v34, %v4570_v21 }
 0x519   : > { %v2295_v10 = vperm.slane %v2287_v2, %v4531_v47 }
 0x51a   : > { %v2285_v13 = vsel %vm2148_vm9, %v2284_v28, %v4564_v44  ;;  %v2331_v28 = vperm.slane %v4553_v24, %v4570_v21 }
 0x51b   : > { %v2291_v53 = vperm.slane %v2285_v13, %v4531_v47 }
 0x51f   : > { %v2141_v17 = vpop.f32.mrf.mxu3 }
 0x520   : > { %v2184_v7 = vrot.slane %v2141_v17, 4  ;;  %v2187_v57 = vsel %vm2148_vm9, %v2141_v17, %v2186_v31 }
 0x521   : > { %v2195_v30 = vperm.slane %v2187_v57, %v4531_v47  ;;  %v2358_v57 = vrot.slane %v2315_v46, 4 }
 0x522   : > { %v2185_v20 = vsel %vm2148_vm9, %v2184_v7, %v2095_v52  ;;  %v2246_v52 = vrot.slane %v4601_v48, 4  ;;  %v2362_v7 = vrot.slane %v2319_v18, 4 }
 0x523   : > { %v2191_v11 = vperm.slane %v2185_v20, %v4531_v47  ;;  %v2232_v15 = vrot.slane %v2195_v30, 4  ;;  %v2235_v39 = vsel %vm2148_vm9, %v2195_v30, %v2234_v32  ;;  %v2346_v32 = vrot.slane %v2295_v10, 4 }
 0x524   : > { %v2243_v25 = vperm.slane %v2235_v39, %v4570_v21 }
 0x525   : > { %v2220_v29 = vrot.slane %v2191_v11, 4  ;;  %v2233_v40 = vsel %vm2148_vm9, %v2232_v15, %v2183_v16  ;;  %v2223_v19 = vsel %vm2148_vm9, %v2191_v11, %v2222_v50  ;;  %v2327_v50 = vperm.slane %v4559_v43, %v4570_v21 }
 0x526   : > { %v2259_v49 = vsel %vm2148_vm9, %v2243_v25, %v2258_v58  ;;  %v2239_v23 = vperm.slane %v2233_v40, %v4570_v21  ;;  %v2231_v12 = vperm.slane %v2223_v19, %v4570_v21  ;;  %v2256_v33 = vrot.slane %v2243_v25, 4 }
 0x527   : > { %2397 = vrot.lane.b32.xlu2 %v2259_v49, %s3109_s28  ;;  %v2144_v60 = vpop.f32.mrf.mxu3  ;;  %v2221_v62 = vsel %vm2148_vm9, %v2220_v29, %v2179_v42  ;;  %v2366_v25 = vrot.slane %v2327_v50, 4  ;;  %v2370_v43 = vrot.slane %v2331_v28, 4  ;;  %s3123_s28 = smov 56  }
 0x528   : > { %v2296_v61 = vrot.slane %v2144_v60, 4  ;;  %v2255_v26 = vsel %vm2148_vm9, %v2239_v23, %v2254_v37  ;;  %v2251_v54 = vsel %vm2148_vm9, %v2231_v12, %v2250_v1  ;;  %v2299_v38 = vsel %vm2148_vm9, %v2144_v60, %v2298_v6 }
 0x529   : > { %2389 = vrot.lane.b32.xlu1 %v2255_v26, %s3110_s26  ;;  %2381 = vrot.lane.b32.xlu0 %v2251_v54, %s3111_s18  ;;  %v2248_v63 = vrot.slane %v2231_v12, 4  ;;  %v4606_v45 = vperm.slane %v2221_v62, %v4570_v21  ;;  %v2307_v51 = vperm.slane %v2299_v38, %v4531_v47  ;;  %v2257_v9 = vsel %vm2148_vm9, %v2256_v33, %v2219_v35  ;;  %s3050_s26 = scalar_lea.hbm %s4697_s10, 16 }
 0x52a   : > { %v2297_v5 = vsel %vm2148_vm9, %v2296_v61, %v2098_v14  ;;  %v2334_v14 = vrot.slane %v2291_v53, 4  ;;  %v2252_v0 = vrot.slane %v2239_v23, 4 }
 0x52b   : > { %v2303_v8 = vperm.slane %v2297_v5, %v4531_v47  ;;  %v2249_v59 = vsel %vm2148_vm9, %v2248_v63, %v2207_v3  ;;  %v2247_v56 = vsel %vm2148_vm9, %v4606_v45, %v2246_v52  ;;  %v2344_v27 = vrot.slane %v2307_v51, 4 }
 0x52c   : > { %v2253_v17 = vsel %vm2148_vm9, %v2252_v0, %v4578_v36  ;;  %v2347_v36 = vsel %vm2148_vm9, %v2307_v51, %v2346_v32  ;;  %v2244_v24 = vrot.slane %v4606_v45, 4 }
 0x52d   : > { %v2332_v55 = vrot.slane %v2303_v8, 4  ;;  %v2335_v44 = vsel %vm2148_vm9, %v2303_v8, %v2334_v14  ;;  %v2345_v42 = vsel %vm2148_vm9, %v2344_v27, %v2295_v10  ;;  %v2355_v39 = vperm.slane %v2347_v36, %v4570_v21  ;;  %v2835_v14 = vld [vmem:[%s4696_s9] ss:$0 sm:$0xff] }
 0x52e   : > { %v2343_v16 = vperm.slane %v2335_v44, %v4570_v21  ;;  %v2351_v34 = vperm.slane %v2345_v42, %v4570_v21  ;;  %v2245_v6 = vsel %vm2148_vm9, %v2244_v24, %v4601_v48 }
 0x52f   : > { %2377 = vrot.lane.b32.xlu2 %v2249_v59, %s3112_s23  ;;  %v2333_v4 = vsel %vm2148_vm9, %v2332_v55, %v2291_v53  ;;  %v2368_v58 = vrot.slane %v2355_v39, 4  ;;  %v2371_v40 = vsel %vm2148_vm9, %v2355_v39, %v2370_v43  ;;  %s2601_s23 = sshll.u32 %s3284_s29, 3 }
 0x530   : > { %v2339_v31 = vperm.slane %v2333_v4, %v4570_v21  ;;  %v2363_v41 = vsel %vm2148_vm9, %v2343_v16, %v2362_v7  ;;  %v2360_v47 = vrot.slane %v2343_v16, 4  ;;  %v2364_v30 = vrot.slane %v2351_v34, 4 }
 0x531   : > { %2393 = vrot.lane.b32.xlu0 %v2257_v9, %s3113_s15  ;;  %2373 = vrot.lane.b32.xlu1 %v2247_v56, %s3114_s5  ;;  %v2367_v29 = vsel %vm2148_vm9, %v2351_v34, %v2366_v25  ;;  %v2369_v37 = vsel %vm2148_vm9, %v2368_v58, %v2331_v28  ;;  %s2715_s15 = sshll.u32 %s3200_s17, 3  ;;  %s2484_s17 = scalar_lea.sflag [#allocation4], %s3284_s29 }
 0x532   : > { %v2359_v35 = vsel %vm2148_vm9, %v2339_v31, %v2358_v57  ;;  %v2356_v20 = vrot.slane %v2339_v31, 4  ;;  %v2361_v3 = vsel %vm2148_vm9, %v2360_v47, %v2319_v18  ;;  %v2365_v11 = vsel %vm2148_vm9, %v2364_v30, %v2327_v50 }
 0x534   : > { %v2357_v15 = vsel %vm2148_vm9, %v2356_v20, %v2315_v46  ;;  %vm2459_vm9 = vcmask 490496  }
 0x537   : > { %2385 = vrot.lane.b32.xlu2 %v2253_v17, %s3115_s8 }
 0x539   : > { %2413 = vrot.lane.b32.xlu1 %v2363_v41, %s3116_s19  ;;  %2405 = vrot.lane.b32.xlu0 %v2359_v35, %s3117_s24  ;;  %s2494_s19 = scalar_lea.hbm %s4697_s10, %s2715_s15  ;;  %s413_s24 = scalar_lea.vmem [#allocation8], %s2601_s23 }
 0x53f   : > { %2409 = vrot.lane.b32.xlu2 %v2361_v3, %s3118_s25  ;;  %s2496_s25 = sshll.u32 %s413_s24, 4  ;;  %s2497_s25 = int_to_ptr.vmem [resolvable:$true] %s2496_s25 }
 0x541   : > { %2417 = vrot.lane.b32.xlu0 %v2365_v11, %s3119_s22  ;;  %2401 = vrot.lane.b32.xlu1 %v2357_v15, %s3120_s30  ;;  %s2498_s22 = sshll.u32 %s2494_s19, 4  ;;  %s2499_s22 = int_to_ptr.hbm [resolvable:$true] %s2498_s22 }
 0x542   : > { %s3044_s30 = sshra.s32 %s2499_s22, 4  ;;  %s3045_s30 = int_to_ptr.hbm [resolvable:$true] %s3044_s30 }
 0x543   : > { %p3051_p11 = scmp.lt.s32.totalorder %s3045_s30, %s4697_s10 }
 0x547   : > { %2421 = vrot.lane.b32.xlu2 %v2367_v29, %s3121_s11  ;;  %s3046_s11 = scalar_lea.hbm %s3045_s30, 8 }
 0x548   : > { %p3047_p1 = scmp.ne.s32.totalorder %s3045_s30, %s3046_s11  ;;  %p3052_p2 = scmp.lt.s32.totalorder %s3050_s26, %s3046_s11 }
 0x549   : > { %2429 = vrot.lane.b32.xlu0 %v2371_v40, %s3122_s12  ;;  %2425 = vrot.lane.b32.xlu1 %v2369_v37, %s3123_s28 }
 0x54a   : > { %p3048_p4 = pnand %p3047_p1, %p3251_p3  ;;  %p3053_p9 = por %p3052_p2, %p3051_p11 }
 0x54c   : > { %p3049_p8 = pneg %p3048_p4 }
 0x54e   : > { %p3054_p10 = pnand %p3053_p9, %p3049_p8 }
 0x581   : > { %v2398_v19 = vpop.permute.xlu2 %2397 }
 0x589   : > { %v2378_v12 = vpop.permute.xlu2 %2377 }
 0x591   : > { %v2386_v61 = vpop.permute.xlu2 %2385 }
 0x599   : > { %v2410_v63 = vpop.permute.xlu2 %2409 }
 0x59b   : > { %v2390_v49 = vpop.permute.xlu1 %2389  ;;  %v2382_v23 = vpop.permute.xlu0 %2381 }
 0x5a1   : > { %v2422_v52 = vpop.permute.xlu2 %2421 }
 0x5a3   : > { %v2394_v21 = vpop.permute.xlu0 %2393  ;;  %v2374_v1 = vpop.permute.xlu1 %2373 }
 0x5a4   : > { %v2433_v60 = vsel %vm2432_vm10, %v2245_v6, %v2374_v1 }
 0x5a5   : > { %v2435_v13 = vsel %vm2434_vm11, %v2433_v60, %v2378_v12 }
 0x5a6   : > { %v2437_v26 = vsel %vm2436_vm12, %v2435_v13, %v2382_v23 }
 0x5a7   : > { %v2439_v54 = vsel %vm2438_vm13, %v2437_v26, %v2386_v61 }
 0x5a8   : > { %v2441_v38 = vsel %vm2440_vm14, %v2439_v54, %v2390_v49 }
 0x5a9   : > { %v2443_v53 = vsel %vm2442_vm15, %v2441_v38, %v2394_v21 }
 0x5aa   : > { %v2445_v33 = vsel %vm2444_vm1, %v2443_v53, %v2398_v19 }
 0x5ab   : > { %v2414_v62 = vpop.permute.xlu1 %2413  ;;  %v2406_v5 = vpop.permute.xlu0 %2405 }
 0x5b3   : > { %v2418_v8 = vpop.permute.xlu0 %2417  ;;  %v2402_v48 = vpop.permute.xlu1 %2401 }
 0x5b4   : > { %v2446_v45 = vsel %vm1956_vm8, %v2445_v33, %v2402_v48 }
 0x5b5   : > { %v2448_v51 = vsel %vm2447_vm2, %v2446_v45, %v2406_v5 }
 0x5b6   : > { %v2450_v55 = vsel %vm2449_vm3, %v2448_v51, %v2410_v63 }
 0x5b7   : > { %v2452_v22 = vsel %vm2451_vm4, %v2450_v55, %v2414_v62 }
 0x5b8   : > { %v2454_v59 = vsel %vm2453_vm5, %v2452_v22, %v2418_v8 }
 0x5b9   : > { %v2456_v9 = vsel %vm2455_vm6, %v2454_v59, %v2422_v52 }
 0x5bb   : > { %v2430_v2 = vpop.permute.xlu0 %2429  ;;  %v2426_v56 = vpop.permute.xlu1 %2425 }
 0x5bc   : > { %v2458_v27 = vsel %vm2457_vm7, %v2456_v9, %v2426_v56 }
 0x5bd   : > { %v2460_v44 = vsel %vm2459_vm9, %v2458_v27, %v2430_v2 }
 0x5be   : > { %v2465_v4 = vadd.f32 %v2835_v14, %v2460_v44 }
 0x5c0   : > { %v2466_v0 = vmul.f32 %v2465_v4, %v2465_v4 }
 0x5c2   : > { %v2467_v18 = vsel %vm447_vm0, %v2466_v0, 0.0 }
 0x5c3   : > { %2468 = vadd.xlane.f32.xlu2 %v2467_v18 }
 0x636   : > { %v2469_v46 = vpop.xlane.xlu2 %2468 }
 0x637   : > { %v2470_v10 = vmax.f32 %v2469_v46, 1e-24 }
 0x639   : > { %2902 = vrsqrt.f32 %v2470_v10  ;;  %vm2477_vm10 = vweird.f32 %v2470_v10 }
 0x63f   : > { %v2903_v16 = vpop.eup %2902 }
 0x640   : > { %v2472_v31 = vmul.f32 %v2903_v16, %v2470_v10  ;;  %vm2478_vm8 = vweird.f32 %v2903_v16 }
 0x641   : > { %vm2479_vm11 = vmor %vm2477_vm10, %vm2478_vm8 }
 0x642   : > { %v2473_v42 = vmul.f32 %v2903_v16, %v2472_v31 }
 0x644   : > { %v2474_v17 = vmul.f32 0.5, %v2473_v42 }
 0x646   : > { %v2475_v7 = vsub.f32 1.5, %v2474_v17 }
 0x648   : > { %v2476_v57 = vmul.f32 %v2903_v16, %v2475_v7 }
 0x64a   : > { %v2480_v41 = vsel %vm2479_vm11, %v2903_v16, %v2476_v57 }
 0x64b   : > { %v2481_v35 = vmul.f32 %v2480_v41, %v2465_v4 }
 0x64d   : > { %2482 = vst.msk [vmem:[%s413_s24] sm:$0xff] %vm447_vm0, %v2481_v35 }
 0x64e   : > { %3057 = shalt.err (!%p3054_p10)
}
 0x64f   : > { %2754 = dma.vmem_to_hbm [thread:$0]  (%p3251_p3), %s2497_s25, 128, %s2499_s22, %s2484_s17  }
 0x650 PF: > { %s2510_s29 = sand.u32 1, %s3088_s13   ;;  %p4740_p12 = scmp.ge.s32.totalorder %s3100_s16, 2 }
 0x651   : > { %s2511_s15 = scalar_lea.sflag [#allocation4], %s2510_s29 }
 0x652   : > { %p2768_p13 = pnand %p4740_p12, %p3214_p6 }
 0x654   : > { %p2769_p0 = pneg %p2768_p13 }
 0x656   : > { %3083 = dma.done.wait (%p2769_p0), %s2511_s15, 128  }
 0x657   : > { %3085 = vsyncadd (%p2769_p0), %s2511_s15, 4294967168  ;;  %s4741_s5 = sld [smem:[#allocation12_spill]]  ;;  %p24_p5 = scmp.ge.s32.totalorder %s3241_s21, 4  }
 0x658   : > { %s4742_s15 = sld [smem:[#allocation13_spill]]  ;;  %s4743_s13 = smov %s3092_s14 }
 0x659   : > { %s4745_s16 = smov %s3241_s21  ;;  %26 = sbr.rel (!%p24_p5) target bundleno = 9 (0x9), region = 113 }
 0x65d   : > { %s4744_s14 = smov %s4741_s5 }
 0x65e   :  { %2517 = vsyncpa [#allocation3], 1 }
 0x65f   :  { %2519 = vsyncpa [#allocation3 + $0x1], 1 }
 0x660   :  { %2520 = vsyncpa [#allocation6], 1 }
 0x661   :  { %2521 = vsyncpa [#allocation4], 1 }
 0x662   :  { %2523 = vsyncpa [#allocation4 + $0x1], 1 }

</bundles_post_ra>
